<compile_context>
chip_gen: v7x
topology: tpu7x:2x2x1
jax: 0.10.0
libtpu: 0.0.40
codegen_flags: <defaults>
</compile_context>

<pallas_src>
import jax
import jax.numpy as jnp
from jax.experimental import pallas as pl
from jax.experimental.pallas import tpu as pltpu

N_NODES = 8          # nodes per graph
IN_FEATS = 32        # F
OUT_FEATS = 16
NUM_REL = 2
NUM_GRAPHS = 128     # B: 1024 node rows -> 8 grid steps (feeds the DMA pipeline)
TILE_ROWS = 128      # node rows per grid step (16 graphs x 8 nodes)
OUT_PAD = 128        # lane-dense padded output width

# Single bf16 MXU pass per matmul (review item: drop HIGHEST f32 emulation).
# Validation tolerance vs. the f32 reference is relaxed in __main__ to match.
MXU_PRECISION = jax.lax.Precision.DEFAULT


def _dot(a, b):
    return jnp.dot(a, b, preferred_element_type=jnp.float32, precision=MXU_PRECISION)


def gcn_layer_kernel(
    x_ref,      # (TILE, F)               node features for this tile
    adj_ref,    # (1, R, TILE, TILE)      bf16 block-diagonal adjacency for this tile
    wrel_ref,   # (R, F, F)               edgeNN lin1 weight^T per relation
    brel_ref,   # (R, 1, F)               edgeNN bias per relation
    wg_ref,     # (3, F, F)               LSTM gate weights^T, order [i, g, o]
    bg_ref,     # (3, 1, F)               LSTM b_ih + b_hh per gate
    w1_ref,     # (F, F/2)                global_update linear 1 (pre-transposed)
    b1_ref,     # (1, F/2)
    w2_ref,     # (F/2, F/2)
    b2_ref,     # (1, F/2)
    w3_ref,     # (F/2, OUT_PAD)          zero-padded to 128 lanes
    b3_ref,     # (1, OUT_PAD)
    out_ref,    # (TILE, OUT_PAD)
):
    x = x_ref[...]                                   # (TILE, F)
    tile, f = x.shape
    num_rel = adj_ref.shape[1]

    # --- edgeNN per relation + block-diagonal adjacency scatter-sum -------------
    # Each relation: two (F->F) matmuls (same weight applied twice, relu after each),
    # then one dense (TILE,TILE)@(TILE,F) MXU pass against the block-diag adjacency.
    agg = jnp.zeros((tile, f), jnp.float32)
    for r in range(num_rel):                          # static unroll (R == 2)
        w = wrel_ref[r]                               # loaded at point of use
        b = brel_ref[r]
        h = jnp.maximum(_dot(x, w) + b, 0.0)          # (TILE, F)
        h = jnp.maximum(_dot(h, w) + b, 0.0)          # (TILE, F)
        adj_r = adj_ref[0, r].astype(jnp.float32)     # (TILE, TILE), exact bf16 counts
        agg = agg + _dot(adj_r, h)                    # (TILE, F)

    # --- apply_func: one LSTM step, zero (h0, c0) --------------------------------
    # h0 == 0 => W_hh term vanishes; c0 == 0 => forget gate contributes nothing.
    # Three separate gate matmuls keep every gate result at lane offset 0.
    i_g = jax.nn.sigmoid(_dot(agg, wg_ref[0]) + bg_ref[0])
    g_g = jnp.tanh(_dot(agg, wg_ref[1]) + bg_ref[1])
    o_g = jax.nn.sigmoid(_dot(agg, wg_ref[2]) + bg_ref[2])
    feat = o_g * jnp.tanh(i_g * g_g)                  # (TILE, F)

    # --- global_update MLP -------------------------------------------------------
    y = jnp.maximum(_dot(feat, w1_ref[...]) + b1_ref[...], 0.0)
    y = jnp.maximum(_dot(y, w2_ref[...]) + b2_ref[...], 0.0)
    out_ref[...] = _dot(y, w3_ref[...]) + b3_ref[...]  # lane-dense (TILE, OUT_PAD) store


def pack_params(params, out_pad=OUT_PAD):
    """Trace-time weight packing: transpose per relation / per gate, pad output."""
    wrel_t = jnp.transpose(params["w_rel"], (0, 2, 1))    # (R, F, F), ready for x @ w
    brel = params["b_rel"]                                 # (R, 1, F)

    # PyTorch LSTM gate order [i, f, g, o]; zero c0 kills the forget gate.
    wg = jnp.stack([params["w_ih"][0].T, params["w_ih"][2].T, params["w_ih"][3].T])
    bg = jnp.stack([params["b_lstm"][0], params["b_lstm"][2], params["b_lstm"][3]])

    w1 = params["w1"].T                                    # (F, F/2)
    b1 = params["b1"]
    w2 = params["w2"].T                                    # (F/2, F/2)
    b2 = params["b2"]
    half = w1.shape[1]
    out_feats = params["w3"].shape[0]
    w3 = jnp.zeros((half, out_pad), jnp.float32).at[:, :out_feats].set(params["w3"].T)
    b3 = jnp.zeros((1, out_pad), jnp.float32).at[:, :out_feats].set(params["b3"])
    return (wrel_t, brel, wg, bg, w1, b1, w2, b2, w3, b3)


def gcn_layer_forward(features, adj, params, *, tile_rows=TILE_ROWS):
    """features: (B, N, F) f32, adj: (B, R, N, N) f32 -> (B, N, OUT) f32."""
    b_graphs, n, f = features.shape
    num_rel = adj.shape[1]
    out_feats = params["w3"].shape[0]

    assert tile_rows % n == 0, "tile must hold whole graphs"
    graphs_per_tile = tile_rows // n
    assert b_graphs % graphs_per_tile == 0, "pad batch to a whole number of tiles"
    num_tiles = b_graphs // graphs_per_tile

    x = features.reshape(b_graphs * n, f)

    # Per-tile block-diagonal adjacency (graphs never straddle a tile boundary):
    #   adj_bd[t, r, g*N+i, h*N+j] = adj[t*gpt+g, r, i, j] if g == h else 0
    # Entries are small integer edge counts -> exact in bf16 (halves the HBM stream).
    adj_t = adj.reshape(num_tiles, graphs_per_tile, num_rel, n, n)
    eye = jnp.eye(graphs_per_tile, dtype=adj.dtype)
    adj_bd = jnp.einsum("tgrij,gh->trgihj", adj_t, eye).reshape(
        num_tiles, num_rel, tile_rows, tile_rows).astype(jnp.bfloat16)

    packed = pack_params(params)

    def const_spec(a):
        nd = a.ndim
        return pl.BlockSpec(a.shape, lambda i, _nd=nd: (0,) * _nd)  # VMEM-resident weights

    in_specs = [
        pl.BlockSpec((tile_rows, f), lambda i: (i, 0)),
        pl.BlockSpec((1, num_rel, tile_rows, tile_rows), lambda i: (i, 0, 0, 0)),
    ] + [const_spec(a) for a in packed]

    out_padded = pl.pallas_call(
        gcn_layer_kernel,
        out_shape=jax.ShapeDtypeStruct((b_graphs * n, OUT_PAD), jnp.float32),
        grid_spec=pltpu.PrefetchScalarGridSpec(
            num_scalar_prefetch=0,
            grid=(num_tiles,),
            in_specs=in_specs,
            out_specs=pl.BlockSpec((tile_rows, OUT_PAD), lambda i: (i, 0)),
        ),
        compiler_params=pltpu.CompilerParams(
            dimension_semantics=("parallel",)),      # 8 tiles -> >=4 steps per TC on v7x
    )(x, adj_bd, *packed)

    return out_padded[:, :out_feats].reshape(b_graphs, n, out_feats)


def init_params(key, in_feats, out_feats, num_rel):
    half = in_feats // 2
    ks = jax.random.split(key, 12)

    def u(k, shape, fan_in):
        bound = 1.0 / jnp.sqrt(fan_in)
        return jax.random.uniform(k, shape, jnp.float32, -bound, bound)

    return {
        # edgeNN.lin1 per relation (PyTorch nn.Linear convention: (out, in))
        "w_rel": u(ks[0], (num_rel, in_feats, in_feats), in_feats),
        "b_rel": u(ks[1], (num_rel, 1, in_feats), in_feats),
        # LSTM(in_feats, in_feats): gates [i, f, g, o]; b = b_ih + b_hh
        "w_ih": u(ks[2], (4, in_feats, in_feats), in_feats),
        "b_lstm": (u(ks[3], (4, 1, in_feats), in_feats)
                   + u(ks[4], (4, 1, in_feats), in_feats)),
        # global_update
        "w1": u(ks[5], (half, in_feats), in_feats),
        "b1": u(ks[6], (1, half), in_feats),
        "w2": u(ks[7], (half, half), half),
        "b2": u(ks[8], (1, half), half),
        "w3": u(ks[9], (out_feats, half), half),
        "b3": u(ks[10], (1, out_feats), half),
    }


def reference_forward(feature, adj, params):
    """Pure-JAX f32 (HIGHEST) reference of one graph's forward pass."""
    def dot(a, b):
        return jnp.dot(a, b, precision=jax.lax.Precision.HIGHEST)

    agg = jnp.zeros_like(feature)
    for r in range(adj.shape[0]):
        w, b = params["w_rel"][r], params["b_rel"][r]
        h = jnp.maximum(dot(feature, w.T) + b, 0.0)
        h = jnp.maximum(dot(h, w.T) + b, 0.0)
        agg = agg + dot(adj[r], h)
    i = jax.nn.sigmoid(dot(agg, params["w_ih"][0].T) + params["b_lstm"][0])
    g = jnp.tanh(dot(agg, params["w_ih"][2].T) + params["b_lstm"][2])
    o = jax.nn.sigmoid(dot(agg, params["w_ih"][3].T) + params["b_lstm"][3])
    feat = o * jnp.tanh(i * g)
    y = jnp.maximum(dot(feat, params["w1"].T) + params["b1"], 0.0)
    y = jnp.maximum(dot(y, params["w2"].T) + params["b2"], 0.0)
    return dot(y, params["w3"].T) + params["b3"]


if __name__ == "__main__":
    key = jax.random.PRNGKey(0)
    k_feat, k_par = jax.random.split(key)

    # Batched node features: B graphs of N nodes each.
    features = jax.random.normal(k_feat, (NUM_GRAPHS, N_NODES, IN_FEATS), jnp.float32)

    # Deterministic small graphs: in graph b, node v gets an in-edge from
    # (v + 1 + b) % N under relation 0 and (v + 3 + 2b) % N under relation 1.
    bidx, rel, dst, src = [], [], [], []
    for b in range(NUM_GRAPHS):
        for v in range(N_NODES):
            src += [(v + 1 + b) % N_NODES, (v + 3 + 2 * b) % N_NODES]
            dst += [v, v]
            rel += [0, 1]
            bidx += [b, b]
    adj = jnp.zeros((NUM_GRAPHS, NUM_REL, N_NODES, N_NODES), jnp.float32)
    adj = adj.at[jnp.array(bidx), jnp.array(rel),
                 jnp.array(dst), jnp.array(src)].add(1.0)

    params = init_params(k_par, IN_FEATS, OUT_FEATS, NUM_REL)

    out = gcn_layer_forward(features, adj, params)
    out = jax.block_until_ready(out)

    ref = jax.vmap(lambda f_, a_: reference_forward(f_, a_, params))(features, adj)
    assert out.shape == (NUM_GRAPHS, N_NODES, OUT_FEATS)
    # Tolerance relaxed vs. the f32 reference because the kernel now uses single-pass
    # bf16 MXU matmuls (Precision.DEFAULT) per the performance review.
    err = float(jnp.max(jnp.abs(out - ref)))
    assert jnp.allclose(out, ref, atol=5e-2, rtol=5e-2), f"mismatch vs reference, max|d|={err}"

    print("KERNEL_OK")
</pallas_src>

<mosaic_0001>
module attributes {stable_mosaic.version = 11 : i64} {
  func.func @gcn_layer_kernel(%arg0: i32, %arg1: memref<128x32xf32, #tpu.memory_space<vmem>>, %arg2: memref<1x2x128x128xbf16, #tpu.memory_space<vmem>>, %arg3: memref<2x32x32xf32, #tpu.memory_space<vmem>>, %arg4: memref<2x1x32xf32, #tpu.memory_space<vmem>>, %arg5: memref<3x32x32xf32, #tpu.memory_space<vmem>>, %arg6: memref<3x1x32xf32, #tpu.memory_space<vmem>>, %arg7: memref<32x16xf32, #tpu.memory_space<vmem>>, %arg8: memref<1x16xf32, #tpu.memory_space<vmem>>, %arg9: memref<16x16xf32, #tpu.memory_space<vmem>>, %arg10: memref<1x16xf32, #tpu.memory_space<vmem>>, %arg11: memref<16x128xf32, #tpu.memory_space<vmem>>, %arg12: memref<1x128xf32, #tpu.memory_space<vmem>>, %arg13: memref<128x128xf32, #tpu.memory_space<vmem>>) attributes {dimension_semantics = [#tpu.dimension_semantics<parallel>], iteration_bounds = array<i64: 8>, scalar_prefetch = 0 : i64, scratch_operands = 0 : i64, tpu.core_type = #tpu.core_type<tc>, window_params = [{transform_indices = @transform_0, window_bounds = array<i64: 128, 32>}, {transform_indices = @transform_1, window_bounds = array<i64: 1, 2, 128, 128>}, {pipeline_mode = #tpu.pipeline_mode<synchronous>, transform_indices = @transform_2, window_bounds = array<i64: 2, 32, 32>}, {pipeline_mode = #tpu.pipeline_mode<synchronous>, transform_indices = @transform_3, window_bounds = array<i64: 2, 1, 32>}, {pipeline_mode = #tpu.pipeline_mode<synchronous>, transform_indices = @transform_4, window_bounds = array<i64: 3, 32, 32>}, {pipeline_mode = #tpu.pipeline_mode<synchronous>, transform_indices = @transform_5, window_bounds = array<i64: 3, 1, 32>}, {pipeline_mode = #tpu.pipeline_mode<synchronous>, transform_indices = @transform_6, window_bounds = array<i64: 32, 16>}, {pipeline_mode = #tpu.pipeline_mode<synchronous>, transform_indices = @transform_7, window_bounds = array<i64: 1, 16>}, {pipeline_mode = #tpu.pipeline_mode<synchronous>, transform_indices = @transform_8, window_bounds = array<i64: 16, 16>}, {pipeline_mode = #tpu.pipeline_mode<synchronous>, transform_indices = @transform_9, window_bounds = array<i64: 1, 16>}, {pipeline_mode = #tpu.pipeline_mode<synchronous>, transform_indices = @transform_10, window_bounds = array<i64: 16, 128>}, {pipeline_mode = #tpu.pipeline_mode<synchronous>, transform_indices = @transform_11, window_bounds = array<i64: 1, 128>}, {transform_indices = @transform_12, window_bounds = array<i64: 128, 128>}]} {
    %c0 = arith.constant 0 : index
    %c0_0 = arith.constant 0 : index
    %0 = vector.load %arg1[%c0, %c0_0] : memref<128x32xf32, #tpu.memory_space<vmem>>, vector<128x32xf32>
    %cst = arith.constant 0.000000e+00 : f32
    %1 = vector.broadcast %cst : f32 to vector<128x32xf32>
    %c0_1 = arith.constant 0 : index
    %c0_2 = arith.constant 0 : index
    %c0_3 = arith.constant 0 : index
    %2 = vector.load %arg3[%c0_1, %c0_2, %c0_3] : memref<2x32x32xf32, #tpu.memory_space<vmem>>, vector<1x32x32xf32>
    %3 = vector.shape_cast %2 : vector<1x32x32xf32> to vector<32x32xf32>
    %c0_4 = arith.constant 0 : index
    %c0_5 = arith.constant 0 : index
    %c0_6 = arith.constant 0 : index
    %4 = vector.load %arg4[%c0_4, %c0_5, %c0_6] : memref<2x1x32xf32, #tpu.memory_space<vmem>>, vector<1x1x32xf32>
    %5 = vector.shape_cast %4 : vector<1x1x32xf32> to vector<1x32xf32>
    %cst_7 = arith.constant dense<0.000000e+00> : vector<128x32xf32>
    %6 = tpu.matmul %0, %3, %cst_7 {dimension_numbers = #tpu.dot_dimension_numbers<[1], [0], [0], [1], [0, 0, 1, 1], [], []>} : vector<128x32xf32>, vector<32x32xf32>, vector<128x32xf32> -> vector<128x32xf32>
    %7 = vector.broadcast %5 : vector<1x32xf32> to vector<128x32xf32>
    %8 = arith.addf %6, %7 : vector<128x32xf32>
    %cst_8 = arith.constant 0.000000e+00 : f32
    %9 = vector.broadcast %cst_8 : f32 to vector<128x32xf32>
    %10 = arith.maximumf %8, %9 : vector<128x32xf32>
    %cst_9 = arith.constant dense<0.000000e+00> : vector<128x32xf32>
    %11 = tpu.matmul %10, %3, %cst_9 {dimension_numbers = #tpu.dot_dimension_numbers<[1], [0], [0], [1], [0, 0, 1, 1], [], []>} : vector<128x32xf32>, vector<32x32xf32>, vector<128x32xf32> -> vector<128x32xf32>
    %12 = vector.broadcast %5 : vector<1x32xf32> to vector<128x32xf32>
    %13 = arith.addf %11, %12 : vector<128x32xf32>
    %cst_10 = arith.constant 0.000000e+00 : f32
    %14 = vector.broadcast %cst_10 : f32 to vector<128x32xf32>
    %15 = arith.maximumf %13, %14 : vector<128x32xf32>
    %c0_11 = arith.constant 0 : index
    %c0_12 = arith.constant 0 : index
    %c0_13 = arith.constant 0 : index
    %c0_14 = arith.constant 0 : index
    %16 = vector.load %arg2[%c0_11, %c0_12, %c0_13, %c0_14] : memref<1x2x128x128xbf16, #tpu.memory_space<vmem>>, vector<1x1x128x128xbf16>
    %17 = vector.shape_cast %16 : vector<1x1x128x128xbf16> to vector<128x128xbf16>
    %18 = arith.extf %17 : vector<128x128xbf16> to vector<128x128xf32>
    %cst_15 = arith.constant dense<0.000000e+00> : vector<128x32xf32>
    %19 = tpu.matmul %18, %15, %cst_15 {dimension_numbers = #tpu.dot_dimension_numbers<[1], [0], [0], [1], [0, 0, 1, 1], [], []>} : vector<128x128xf32>, vector<128x32xf32>, vector<128x32xf32> -> vector<128x32xf32>
    %20 = arith.addf %1, %19 : vector<128x32xf32>
    %c1 = arith.constant 1 : index
    %c0_16 = arith.constant 0 : index
    %c0_17 = arith.constant 0 : index
    %21 = vector.load %arg3[%c1, %c0_16, %c0_17] : memref<2x32x32xf32, #tpu.memory_space<vmem>>, vector<1x32x32xf32>
    %22 = vector.shape_cast %21 : vector<1x32x32xf32> to vector<32x32xf32>
    %c1_18 = arith.constant 1 : index
    %c0_19 = arith.constant 0 : index
    %c0_20 = arith.constant 0 : index
    %23 = vector.load %arg4[%c1_18, %c0_19, %c0_20] : memref<2x1x32xf32, #tpu.memory_space<vmem>>, vector<1x1x32xf32>
    %24 = vector.shape_cast %23 : vector<1x1x32xf32> to vector<1x32xf32>
    %cst_21 = arith.constant dense<0.000000e+00> : vector<128x32xf32>
    %25 = tpu.matmul %0, %22, %cst_21 {dimension_numbers = #tpu.dot_dimension_numbers<[1], [0], [0], [1], [0, 0, 1, 1], [], []>} : vector<128x32xf32>, vector<32x32xf32>, vector<128x32xf32> -> vector<128x32xf32>
    %26 = vector.broadcast %24 : vector<1x32xf32> to vector<128x32xf32>
    %27 = arith.addf %25, %26 : vector<128x32xf32>
    %cst_22 = arith.constant 0.000000e+00 : f32
    %28 = vector.broadcast %cst_22 : f32 to vector<128x32xf32>
    %29 = arith.maximumf %27, %28 : vector<128x32xf32>
    %cst_23 = arith.constant dense<0.000000e+00> : vector<128x32xf32>
    %30 = tpu.matmul %29, %22, %cst_23 {dimension_numbers = #tpu.dot_dimension_numbers<[1], [0], [0], [1], [0, 0, 1, 1], [], []>} : vector<128x32xf32>, vector<32x32xf32>, vector<128x32xf32> -> vector<128x32xf32>
    %31 = vector.broadcast %24 : vector<1x32xf32> to vector<128x32xf32>
    %32 = arith.addf %30, %31 : vector<128x32xf32>
    %cst_24 = arith.constant 0.000000e+00 : f32
    %33 = vector.broadcast %cst_24 : f32 to vector<128x32xf32>
    %34 = arith.maximumf %32, %33 : vector<128x32xf32>
    %c0_25 = arith.constant 0 : index
    %c1_26 = arith.constant 1 : index
    %c0_27 = arith.constant 0 : index
    %c0_28 = arith.constant 0 : index
    %35 = vector.load %arg2[%c0_25, %c1_26, %c0_27, %c0_28] : memref<1x2x128x128xbf16, #tpu.memory_space<vmem>>, vector<1x1x128x128xbf16>
    %36 = vector.shape_cast %35 : vector<1x1x128x128xbf16> to vector<128x128xbf16>
    %37 = arith.extf %36 : vector<128x128xbf16> to vector<128x128xf32>
    %cst_29 = arith.constant dense<0.000000e+00> : vector<128x32xf32>
    %38 = tpu.matmul %37, %34, %cst_29 {dimension_numbers = #tpu.dot_dimension_numbers<[1], [0], [0], [1], [0, 0, 1, 1], [], []>} : vector<128x128xf32>, vector<128x32xf32>, vector<128x32xf32> -> vector<128x32xf32>
    %39 = arith.addf %20, %38 : vector<128x32xf32>
    %c0_30 = arith.constant 0 : index
    %c0_31 = arith.constant 0 : index
    %c0_32 = arith.constant 0 : index
    %40 = vector.load %arg5[%c0_30, %c0_31, %c0_32] : memref<3x32x32xf32, #tpu.memory_space<vmem>>, vector<1x32x32xf32>
    %41 = vector.shape_cast %40 : vector<1x32x32xf32> to vector<32x32xf32>
    %cst_33 = arith.constant dense<0.000000e+00> : vector<128x32xf32>
    %42 = tpu.matmul %39, %41, %cst_33 {dimension_numbers = #tpu.dot_dimension_numbers<[1], [0], [0], [1], [0, 0, 1, 1], [], []>} : vector<128x32xf32>, vector<32x32xf32>, vector<128x32xf32> -> vector<128x32xf32>
    %c0_34 = arith.constant 0 : index
    %c0_35 = arith.constant 0 : index
    %c0_36 = arith.constant 0 : index
    %43 = vector.load %arg6[%c0_34, %c0_35, %c0_36] : memref<3x1x32xf32, #tpu.memory_space<vmem>>, vector<1x1x32xf32>
    %44 = vector.shape_cast %43 : vector<1x1x32xf32> to vector<1x32xf32>
    %45 = vector.broadcast %44 : vector<1x32xf32> to vector<128x32xf32>
    %46 = arith.addf %42, %45 : vector<128x32xf32>
    %47 = arith.negf %46 : vector<128x32xf32>
    %48 = math.exp %47 : vector<128x32xf32>
    %cst_37 = arith.constant 1.000000e+00 : f32
    %49 = vector.broadcast %cst_37 : f32 to vector<128x32xf32>
    %50 = arith.addf %49, %48 : vector<128x32xf32>
    %51 = arith.divf %49, %50 : vector<128x32xf32>
    %c1_38 = arith.constant 1 : index
    %c0_39 = arith.constant 0 : index
    %c0_40 = arith.constant 0 : index
    %52 = vector.load %arg5[%c1_38, %c0_39, %c0_40] : memref<3x32x32xf32, #tpu.memory_space<vmem>>, vector<1x32x32xf32>
    %53 = vector.shape_cast %52 : vector<1x32x32xf32> to vector<32x32xf32>
    %cst_41 = arith.constant dense<0.000000e+00> : vector<128x32xf32>
    %54 = tpu.matmul %39, %53, %cst_41 {dimension_numbers = #tpu.dot_dimension_numbers<[1], [0], [0], [1], [0, 0, 1, 1], [], []>} : vector<128x32xf32>, vector<32x32xf32>, vector<128x32xf32> -> vector<128x32xf32>
    %c1_42 = arith.constant 1 : index
    %c0_43 = arith.constant 0 : index
    %c0_44 = arith.constant 0 : index
    %55 = vector.load %arg6[%c1_42, %c0_43, %c0_44] : memref<3x1x32xf32, #tpu.memory_space<vmem>>, vector<1x1x32xf32>
    %56 = vector.shape_cast %55 : vector<1x1x32xf32> to vector<1x32xf32>
    %57 = vector.broadcast %56 : vector<1x32xf32> to vector<128x32xf32>
    %58 = arith.addf %54, %57 : vector<128x32xf32>
    %59 = math.tanh %58 : vector<128x32xf32>
    %c2 = arith.constant 2 : index
    %c0_45 = arith.constant 0 : index
    %c0_46 = arith.constant 0 : index
    %60 = vector.load %arg5[%c2, %c0_45, %c0_46] : memref<3x32x32xf32, #tpu.memory_space<vmem>>, vector<1x32x32xf32>
    %61 = vector.shape_cast %60 : vector<1x32x32xf32> to vector<32x32xf32>
    %cst_47 = arith.constant dense<0.000000e+00> : vector<128x32xf32>
    %62 = tpu.matmul %39, %61, %cst_47 {dimension_numbers = #tpu.dot_dimension_numbers<[1], [0], [0], [1], [0, 0, 1, 1], [], []>} : vector<128x32xf32>, vector<32x32xf32>, vector<128x32xf32> -> vector<128x32xf32>
    %c2_48 = arith.constant 2 : index
    %c0_49 = arith.constant 0 : index
    %c0_50 = arith.constant 0 : index
    %63 = vector.load %arg6[%c2_48, %c0_49, %c0_50] : memref<3x1x32xf32, #tpu.memory_space<vmem>>, vector<1x1x32xf32>
    %64 = vector.shape_cast %63 : vector<1x1x32xf32> to vector<1x32xf32>
    %65 = vector.broadcast %64 : vector<1x32xf32> to vector<128x32xf32>
    %66 = arith.addf %62, %65 : vector<128x32xf32>
    %67 = arith.negf %66 : vector<128x32xf32>
    %68 = math.exp %67 : vector<128x32xf32>
    %cst_51 = arith.constant 1.000000e+00 : f32
    %69 = vector.broadcast %cst_51 : f32 to vector<128x32xf32>
    %70 = arith.addf %69, %68 : vector<128x32xf32>
    %71 = arith.divf %69, %70 : vector<128x32xf32>
    %72 = arith.mulf %51, %59 : vector<128x32xf32>
    %73 = math.tanh %72 : vector<128x32xf32>
    %74 = arith.mulf %71, %73 : vector<128x32xf32>
    %c0_52 = arith.constant 0 : index
    %c0_53 = arith.constant 0 : index
    %75 = vector.load %arg7[%c0_52, %c0_53] : memref<32x16xf32, #tpu.memory_space<vmem>>, vector<32x16xf32>
    %cst_54 = arith.constant dense<0.000000e+00> : vector<128x16xf32>
    %76 = tpu.matmul %74, %75, %cst_54 {dimension_numbers = #tpu.dot_dimension_numbers<[1], [0], [0], [1], [0, 0, 1, 1], [], []>} : vector<128x32xf32>, vector<32x16xf32>, vector<128x16xf32> -> vector<128x16xf32>
    %c0_55 = arith.constant 0 : index
    %c0_56 = arith.constant 0 : index
    %77 = vector.load %arg8[%c0_55, %c0_56] : memref<1x16xf32, #tpu.memory_space<vmem>>, vector<1x16xf32>
    %78 = vector.broadcast %77 : vector<1x16xf32> to vector<128x16xf32>
    %79 = arith.addf %76, %78 : vector<128x16xf32>
    %cst_57 = arith.constant 0.000000e+00 : f32
    %80 = vector.broadcast %cst_57 : f32 to vector<128x16xf32>
    %81 = arith.maximumf %79, %80 : vector<128x16xf32>
    %c0_58 = arith.constant 0 : index
    %c0_59 = arith.constant 0 : index
    %82 = vector.load %arg9[%c0_58, %c0_59] : memref<16x16xf32, #tpu.memory_space<vmem>>, vector<16x16xf32>
    %cst_60 = arith.constant dense<0.000000e+00> : vector<128x16xf32>
    %83 = tpu.matmul %81, %82, %cst_60 {dimension_numbers = #tpu.dot_dimension_numbers<[1], [0], [0], [1], [0, 0, 1, 1], [], []>} : vector<128x16xf32>, vector<16x16xf32>, vector<128x16xf32> -> vector<128x16xf32>
    %c0_61 = arith.constant 0 : index
    %c0_62 = arith.constant 0 : index
    %84 = vector.load %arg10[%c0_61, %c0_62] : memref<1x16xf32, #tpu.memory_space<vmem>>, vector<1x16xf32>
    %85 = vector.broadcast %84 : vector<1x16xf32> to vector<128x16xf32>
    %86 = arith.addf %83, %85 : vector<128x16xf32>
    %cst_63 = arith.constant 0.000000e+00 : f32
    %87 = vector.broadcast %cst_63 : f32 to vector<128x16xf32>
    %88 = arith.maximumf %86, %87 : vector<128x16xf32>
    %c0_64 = arith.constant 0 : index
    %c0_65 = arith.constant 0 : index
    %89 = vector.load %arg11[%c0_64, %c0_65] : memref<16x128xf32, #tpu.memory_space<vmem>>, vector<16x128xf32>
    %cst_66 = arith.constant dense<0.000000e+00> : vector<128x128xf32>
    %90 = tpu.matmul %88, %89, %cst_66 {dimension_numbers = #tpu.dot_dimension_numbers<[1], [0], [0], [1], [0, 0, 1, 1], [], []>} : vector<128x16xf32>, vector<16x128xf32>, vector<128x128xf32> -> vector<128x128xf32>
    %c0_67 = arith.constant 0 : index
    %c0_68 = arith.constant 0 : index
    %91 = vector.load %arg12[%c0_67, %c0_68] : memref<1x128xf32, #tpu.memory_space<vmem>>, vector<1x128xf32>
    %92 = vector.broadcast %91 : vector<1x128xf32> to vector<128x128xf32>
    %93 = arith.addf %90, %92 : vector<128x128xf32>
    %c0_69 = arith.constant 0 : index
    %c0_70 = arith.constant 0 : index
    %94 = vector.load %arg13[%c0_69, %c0_70] : memref<128x128xf32, #tpu.memory_space<vmem>>, vector<128x128xf32>
    tpu.vector_store %arg13[%c0_69, %c0_70], %93 {strides = array<i32>} : memref<128x128xf32, #tpu.memory_space<vmem>>, vector<128x128xf32>,
    return
  }
  func.func @transform_0(%arg0: i32) -> (i32, i32) {
    %c0_i32 = arith.constant 0 : i32
    %c0_i32_0 = arith.constant 0 : i32
    return %arg0, %c0_i32 : i32, i32
  }
  func.func @transform_1(%arg0: i32) -> (i32, i32, i32, i32) {
    %c0_i32 = arith.constant 0 : i32
    %c0_i32_0 = arith.constant 0 : i32
    %c0_i32_1 = arith.constant 0 : i32
    %c0_i32_2 = arith.constant 0 : i32
    return %arg0, %c0_i32, %c0_i32_0, %c0_i32_1 : i32, i32, i32, i32
  }
  func.func @transform_2(%arg0: i32) -> (i32, i32, i32) {
    %c0_i32 = arith.constant 0 : i32
    %c0_i32_0 = arith.constant 0 : i32
    %c0_i32_1 = arith.constant 0 : i32
    %c0_i32_2 = arith.constant 0 : i32
    return %c0_i32, %c0_i32_0, %c0_i32_1 : i32, i32, i32
  }
  func.func @transform_3(%arg0: i32) -> (i32, i32, i32) {
    %c0_i32 = arith.constant 0 : i32
    %c0_i32_0 = arith.constant 0 : i32
    %c0_i32_1 = arith.constant 0 : i32
    %c0_i32_2 = arith.constant 0 : i32
    return %c0_i32, %c0_i32_0, %c0_i32_1 : i32, i32, i32
  }
  func.func @transform_4(%arg0: i32) -> (i32, i32, i32) {
    %c0_i32 = arith.constant 0 : i32
    %c0_i32_0 = arith.constant 0 : i32
    %c0_i32_1 = arith.constant 0 : i32
    %c0_i32_2 = arith.constant 0 : i32
    return %c0_i32, %c0_i32_0, %c0_i32_1 : i32, i32, i32
  }
  func.func @transform_5(%arg0: i32) -> (i32, i32, i32) {
    %c0_i32 = arith.constant 0 : i32
    %c0_i32_0 = arith.constant 0 : i32
    %c0_i32_1 = arith.constant 0 : i32
    %c0_i32_2 = arith.constant 0 : i32
    return %c0_i32, %c0_i32_0, %c0_i32_1 : i32, i32, i32
  }
  func.func @transform_6(%arg0: i32) -> (i32, i32) {
    %c0_i32 = arith.constant 0 : i32
    %c0_i32_0 = arith.constant 0 : i32
    %c0_i32_1 = arith.constant 0 : i32
    return %c0_i32, %c0_i32_0 : i32, i32
  }
  func.func @transform_7(%arg0: i32) -> (i32, i32) {
    %c0_i32 = arith.constant 0 : i32
    %c0_i32_0 = arith.constant 0 : i32
    %c0_i32_1 = arith.constant 0 : i32
    return %c0_i32, %c0_i32_0 : i32, i32
  }
  func.func @transform_8(%arg0: i32) -> (i32, i32) {
    %c0_i32 = arith.constant 0 : i32
    %c0_i32_0 = arith.constant 0 : i32
    %c0_i32_1 = arith.constant 0 : i32
    return %c0_i32, %c0_i32_0 : i32, i32
  }
  func.func @transform_9(%arg0: i32) -> (i32, i32) {
    %c0_i32 = arith.constant 0 : i32
    %c0_i32_0 = arith.constant 0 : i32
    %c0_i32_1 = arith.constant 0 : i32
    return %c0_i32, %c0_i32_0 : i32, i32
  }
  func.func @transform_10(%arg0: i32) -> (i32, i32) {
    %c0_i32 = arith.constant 0 : i32
    %c0_i32_0 = arith.constant 0 : i32
    %c0_i32_1 = arith.constant 0 : i32
    return %c0_i32, %c0_i32_0 : i32, i32
  }
  func.func @transform_11(%arg0: i32) -> (i32, i32) {
    %c0_i32 = arith.constant 0 : i32
    %c0_i32_0 = arith.constant 0 : i32
    %c0_i32_1 = arith.constant 0 : i32
    return %c0_i32, %c0_i32_0 : i32, i32
  }
  func.func @transform_12(%arg0: i32) -> (i32, i32) {
    %c0_i32 = arith.constant 0 : i32
    %c0_i32_0 = arith.constant 0 : i32
    return %arg0, %c0_i32 : i32, i32
  }
}

</mosaic_0001>

<bundles_post_ra>
// kernel: tpu_custom_call.1
= control target key start
LH: loop header
LB: loop body
LE: loop exit
PB: predicated region body
PF: predicated region fallthrough
CT: control target
= control target key end

     0   :  { %17 = vsyncpa [#allocation3], 0  ;;  %s5424_s0 = inlined_call_operand.vmem [shape: f32[1024,32], index: 0, kind: input, shape index: {}]   ;;  %s5425_s1 = inlined_call_operand.vmem [shape: bf16[8,2,128,128], index: 1, kind: input, shape index: {}]   ;;  %s5426_s2 = inlined_call_operand.vmem [shape: f32[2,32,32], index: 2, kind: input, shape index: {}]   ;;  %s5427_s3 = inlined_call_operand.vmem [shape: f32[2,1,32], index: 3, kind: input, shape index: {}]   ;;  %s5428_s4 = inlined_call_operand.vmem [shape: f32[3,32,32], index: 4, kind: input, shape index: {}]   ;;  %s5429_s5 = inlined_call_operand.vmem [shape: f32[3,1,32], index: 5, kind: input, shape index: {}]   ;;  %s5430_s6 = inlined_call_operand.vmem [shape: f32[32,16], index: 6, kind: input, shape index: {}]   ;;  %s5431_s7 = inlined_call_operand.vmem [shape: f32[1,16], index: 7, kind: input, shape index: {}]   ;;  %s5432_s8 = inlined_call_operand.vmem [shape: f32[16,16], index: 8, kind: input, shape index: {}]   ;;  %s5433_s9 = inlined_call_operand.vmem [shape: f32[1,16], index: 9, kind: input, shape index: {}]   ;;  %s5434_s10 = inlined_call_operand.vmem [shape: f32[16,128], index: 10, kind: input, shape index: {}]   ;;  %s5435_s11 = inlined_call_operand.vmem [shape: f32[1,128], index: 11, kind: input, shape index: {}]   ;;  %s5436_s12 = inlined_call_operand.hbm [shape: f32[1024,128], index: 12, kind: output, shape index: {}]  }
   0x1   :  { %19 = vsyncpa [#allocation3 + $0x1], 0  ;;  %s4667_s21 = smov 0   ;;  %s4669_s22 = smov 0  }
   0x2   :  { %s4671_s23 = smov 0   ;;  %s4673_s24 = smov 0  }
   0x3 LB: > { %5438 = sst [smem:[#allocation5_spill]] %s4593_s23  ;;  %s4688_s25 = sadd.s32 4294967295, %s4597_s24   ;;  %s4597_s24 = sphi %s4673_s24, %s5446_s24   ;;  %s4593_s23 = sphi %s4671_s23, %s5443_s23   ;;  %s4589_s22 = sphi %s4669_s22, %s5445_s22   ;;  %s4585_s21 = sphi %s4667_s21, %s5444_s21  }
   0x4   : > { %s3140_s26 = sadd.s32 4294967294, %s4597_s24   ;;  %s4692_s27 = sadd.s32 1, %s4597_s24  }
   0x5   : > { %s294_s28 = sadd.s32 1, %s4593_s23  ;;  %s291_s29 = ssub.s32 %s4597_s24, %s4692_s27 }
   0x6   : > { %p304_p0 = scmp.ne.s32.totalorder %s4593_s23, %s4589_s22  ;;  %p292_p1 = scmp.eq.s32.totalorder %s291_s29, 0 }
   0x7   : > { %p305_p2 = scmp.eq.s32.totalorder %s4688_s25, 7  ;;  %p310_p3 = scmp.ne.s32.totalorder %s4589_s22, %s4585_s21 }
   0x8   : > { %p311_p4 = scmp.eq.s32.totalorder %s3140_s26, 7  ;;  %p3143_p7 = scmp.ge.s32.totalorder %s4597_s24, 1 }
   0x9   : > { %s4703_s30 = scalar_select %p292_p1, %s4593_s23, %s294_s28  }
   0xa   : > { %p4705_p5 = por %p305_p2, %p304_p0  ;;  %p4709_p6 = por %p311_p4, %p310_p3 }
   0xb   : > { %5439 = sst [smem:[#allocation6_spill]] %s4703_s30  ;;  %p376_p8 = scmp.lt.s32.totalorder %s4597_s24, 9 }
   0xd   : > { %p377_p9 = pnand %p3143_p7, %p376_p8 }
   0xe   : > { %v451_v0 = vld [vmem:[%s5426_s2] sm:$0xff] (!%p377_p9)  ;;  %v452_v1 = vld [vmem:[%s5426_s2 + $0x8] sm:$0xff] (!%p377_p9)  ;;  %v453_v2 = vld [vmem:[%s5426_s2 + $0x10] sm:$0xff] (!%p377_p9)  ;;  %s3145_s26 = sshll.u32 (!%p377_p9), %s4688_s25, 4  ;;  %vm462_vm0 = vcmask (!%p377_p9), 261120   ;;  %p429_p11 = scmp.lt.s32.totalorder (!%p377_p9), %s4688_s25, 7 }
   0xf   : > { %380 = sbr.rel (%p377_p9) target bundleno = 1776 (0x6f0), region = 68  ;;  %v4150_v3 = vpack.c.bf16 (!%p377_p9), %v452_v1, %v451_v0  ;;  %v454_v4 = vld [vmem:[%s5426_s2 + $0x18] sm:$0xff] (!%p377_p9)  ;;  %p424_p10 = scmp.lt.s32.totalorder (!%p377_p9), %s3145_s26, 127  ;;  %v3182_v6 = vld [vmem:[%s5426_s2 + $0x20] sm:$0xff] (!%p377_p9)  ;;  %v3183_v7 = vld [vmem:[%s5426_s2 + $0x28] sm:$0xff] (!%p377_p9)  ;;  %vm2624_vm1 = vcmask (!%p377_p9), 130048  }
  0x10   : > { %v4154_v5 = vpack.c.bf16 (!%p377_p9), %v454_v4, %v453_v2  ;;  %v4734_v8 = vpack.c.bf16 (!%p377_p9), %v3183_v7, %v3182_v6  ;;  %v3184_v9 = vld [vmem:[%s5426_s2 + $0x30] sm:$0xff] (!%p377_p9)  ;;  %v3185_v10 = vld [vmem:[%s5426_s2 + $0x38] sm:$0xff] (!%p377_p9)  ;;  %v4805_v28 = vld [vmem:[%s5427_s3] ss:$0 sm:$0xff] (!%p377_p9) }
  0x11   : > { %4151 = vmatprep.subr.bf16.mxu0 (!%p377_p9), %v4150_v3  ;;  %4159 = vmatprep.subr.bf16.mxu1 (!%p377_p9), %v4150_v3  ;;  %v4752_v14 = vpack.c.bf16 (!%p377_p9), %v3185_v10, %v3184_v9 }
  0x12   : > { %4153 = vmatpush3.bf16.msra.mxu0 (!%p377_p9), %v4150_v3  ;;  %4161 = vmatpush3.bf16.msra.mxu1 (!%p377_p9), %v4150_v3 }
  0x13   : > { %4155 = vmatprep.subr.bf16.mxu0 (!%p377_p9), %v4154_v5  ;;  %4163 = vmatprep.subr.bf16.mxu1 (!%p377_p9), %v4154_v5 }
  0x16   : > { %s5448_s26 = smov (!%p424_p10, %s3145_s26), 127  ;;  %4157 = vmatpush3.bf16.msra.mxu0 %v4154_v5  ;;  %4165 = vmatpush3.bf16.msra.mxu1 %v4154_v5 }
  0x17   : > { %s3146_s17 = sshll.u32 %s5448_s26, 3  ;;  %4167 = vmatprep.subr.bf16.mxu0 %v4734_v8  ;;  %4175 = vmatprep.subr.bf16.mxu1 %v4734_v8  ;;  %s3386_s26 = sshll.u32 %s4688_s25, 11 }
  0x18   : > { %s4739_s30 = scalar_lea.vmem %s5424_s0, %s3146_s17  ;;  %s5375_s17 = scalar_lea.hbm %s5436_s12, %s3386_s26 }
  0x19   : > { %v435_v11 = vld [vmem:[%s4739_s30] sm:$0xff]  ;;  %v436_v12 = vld [vmem:[%s4739_s30 + $0x8] sm:$0xff]  ;;  %v437_v13 = vld [vmem:[%s4739_s30 + $0x10] sm:$0xff]  ;;  %s430_s18 = scalar_select %p429_p11, %s4688_s25, 7 }
  0x1a   : > { %3734 = vmatprep.mubr.msk.f32.mxu0 %vm462_vm0, %v435_v11  ;;  %v438_v15 = vld [vmem:[%s4739_s30 + $0x18] sm:$0xff]  ;;  %v439_v16 = vld [vmem:[%s4739_s30 + $0x20] sm:$0xff]  ;;  %v440_v17 = vld [vmem:[%s4739_s30 + $0x28] sm:$0xff] }
  0x1b   : > { %3735 = vmatmul.mubr.msk.f32.vlgmr.msra.gmra.mrb[0].mxu0 %vm462_vm0, %v436_v12  ;;  %v441_v18 = vld [vmem:[%s4739_s30 + $0x30] sm:$0xff]  ;;  %v442_v19 = vld [vmem:[%s4739_s30 + $0x38] sm:$0xff]  ;;  %v443_v20 = vld [vmem:[%s4739_s30 + $0x40] sm:$0xff]  ;;  %s3385_s19 = sshll.u32 %s430_s18, 7 }
  0x1c   : > { %4169 = vmatpush3.bf16.msra.mxu0 %v4734_v8  ;;  %3737 = vmatprep.mubr.msk.f32.mxu0 %vm462_vm0, %v437_v13  ;;  %v444_v21 = vld [vmem:[%s4739_s30 + $0x48] sm:$0xff]  ;;  %v445_v22 = vld [vmem:[%s4739_s30 + $0x50] sm:$0xff]  ;;  %v446_v23 = vld [vmem:[%s4739_s30 + $0x58] sm:$0xff]  ;;  %s4884_s28 = scalar_lea.vmem %s5425_s1, %s3385_s19  ;;  %s420_s19 = sand.u32 1, %s4589_s22  }
  0x1d   : > { %4171 = vmatprep.subr.bf16.mxu0 %v4752_v14  ;;  %v447_v24 = vld [vmem:[%s4739_s30 + $0x60] sm:$0xff]  ;;  %v448_v25 = vld [vmem:[%s4739_s30 + $0x68] sm:$0xff]  ;;  %v449_v26 = vld [vmem:[%s4739_s30 + $0x70] sm:$0xff]  ;;  %s5383_s25 = scalar_lea.sflag [#allocation3], %s420_s19 }
  0x1e   : > { %v450_v27 = vld [vmem:[%s4739_s30 + $0x78] sm:$0xff]  ;;  %s3144_s30 = sshll.u32 %s420_s19, 7 }
  0x1f   : > { %3738 = vmatmul.mubr.msk.f32.gmra.mrb[2].mxu0 %vm462_vm0, %v438_v15 }
  0x20   : > { %3740 = vmatprep.mubr.msk.f32.mxu0 %vm462_vm0, %v439_v16  ;;  %4173 = vmatpush3.bf16.msra.mxu0 %v4752_v14 }
  0x23   : > { %3741 = vmatmul.mubr.msk.f32.gmra.mrb[4].mxu0 %vm462_vm0, %v440_v17 }
  0x24   : > { %3743 = vmatprep.mubr.msk.f32.mxu0 %vm462_vm0, %v441_v18 }
  0x27   : > { %3744 = vmatmul.mubr.msk.f32.gmra.mrb[6].mxu0 %vm462_vm0, %v442_v19 }
  0x28   : > { %3746 = vmatprep.mubr.msk.f32.mxu0 %vm462_vm0, %v443_v20 }
  0x2b   : > { %3747 = vmatmul.mubr.msk.f32.gmra.mrb[8].mxu0 %vm462_vm0, %v444_v21 }
  0x2c   : > { %3749 = vmatprep.mubr.msk.f32.mxu0 %vm462_vm0, %v445_v22 }
  0x2f   : > { %3750 = vmatmul.mubr.msk.f32.gmra.mrb[10].mxu0 %vm462_vm0, %v446_v23 }
  0x30   : > { %3752 = vmatprep.mubr.msk.f32.mxu0 %vm462_vm0, %v447_v24 }
  0x33   : > { %3753 = vmatmul.mubr.msk.f32.gmra.mrb[12].mxu0 %vm462_vm0, %v448_v25 }
  0x34   : > { %3755 = vmatprep.mubr.msk.f32.mxu0 %vm462_vm0, %v449_v26 }
  0x37   : > { %3756 = vmatmul.mubr.msk.f32.gmra.mrb[14].mxu0 %vm462_vm0, %v450_v27 }
  0x38   : > { %3798 = vmatprep.mubr.msk.f32.mxu0 %vm462_vm0, %v435_v11  ;;  %v4842_v11 = vld [vmem:[%s5427_s3 + $0x1] ss:$0 sm:$0xff] }
  0x3b   : > { %3799 = vmatmul.mubr.msk.f32.vlgmr.msra.gmra.mrb[16].mxu0 %vm462_vm0, %v436_v12 }
  0x3c   : > { %3801 = vmatprep.mubr.msk.f32.mxu0 %vm462_vm0, %v437_v13 }
  0x3f   : > { %3802 = vmatmul.mubr.msk.f32.gmra.mrb[18].mxu0 %vm462_vm0, %v438_v15 }
  0x40   : > { %3804 = vmatprep.mubr.msk.f32.mxu0 %vm462_vm0, %v439_v16 }
  0x43   : > { %3805 = vmatmul.mubr.msk.f32.gmra.mrb[20].mxu0 %vm462_vm0, %v440_v17 }
  0x44   : > { %3807 = vmatprep.mubr.msk.f32.mxu0 %vm462_vm0, %v441_v18 }
  0x47   : > { %3808 = vmatmul.mubr.msk.f32.gmra.mrb[22].mxu0 %vm462_vm0, %v442_v19 }
  0x48   : > { %3810 = vmatprep.mubr.msk.f32.mxu0 %vm462_vm0, %v443_v20 }
  0x4b   : > { %3811 = vmatmul.mubr.msk.f32.gmra.mrb[24].mxu0 %vm462_vm0, %v444_v21 }
  0x4c   : > { %3813 = vmatprep.mubr.msk.f32.mxu0 %vm462_vm0, %v445_v22 }
  0x4f   : > { %3814 = vmatmul.mubr.msk.f32.gmra.mrb[26].mxu0 %vm462_vm0, %v446_v23 }
  0x50   : > { %3816 = vmatprep.mubr.msk.f32.mxu0 %vm462_vm0, %v447_v24 }
  0x53   : > { %3817 = vmatmul.mubr.msk.f32.gmra.mrb[28].mxu0 %vm462_vm0, %v448_v25 }
  0x54   : > { %3819 = vmatprep.mubr.msk.f32.mxu0 %vm462_vm0, %v449_v26 }
  0x57   : > { %3820 = vmatmul.mubr.msk.f32.gmra.mrb[30].mxu0 %vm462_vm0, %v450_v27 }
  0xee   : > { %v3736_v29 = vpop.f32.mrb[0].mxu0 }
  0xef   : > { %v583_v30 = vadd.f32 %v3736_v29, %v4805_v28  ;;  %v577_v31 = vpop.f32.mrb[1].mxu0 }
  0xf0   : > { %v578_v32 = vadd.f32 %v4805_v28, %v577_v31 }
  0xf1   : > { %v657_v35 = vmax.f32 %v583_v30, 0.0 }
  0xf2   : > { %v656_v33 = vmax.f32 %v578_v32, 0.0  ;;  %v3739_v34 = vpop.f32.mrb[2].mxu0 }
  0xf3   : > { %v593_v36 = vadd.f32 %v3739_v34, %v4805_v28  ;;  %v587_v37 = vpop.f32.mrb[3].mxu0 }
  0xf4   : > { %v588_v38 = vadd.f32 %v4805_v28, %v587_v37  ;;  %3766 = vmatprep.mubr.msk.f32.mxu1 %vm462_vm0, %v656_v33 }
  0xf5   : > { %3767 = vmatmul.mubr.msk.f32.vlgmr.msra.gmra.mrb[0].mxu1 %vm462_vm0, %v657_v35  ;;  %v659_v41 = vmax.f32 %v593_v36, 0.0 }
  0xf6   : > { %v658_v39 = vmax.f32 %v588_v38, 0.0  ;;  %v3742_v40 = vpop.f32.mrb[4].mxu0  ;;  %4177 = vmatpush3.bf16.msra.mxu1 %v4734_v8 }
  0xf7   : > { %v603_v42 = vadd.f32 %v3742_v40, %v4805_v28  ;;  %v597_v43 = vpop.f32.mrb[5].mxu0  ;;  %4179 = vmatprep.subr.bf16.mxu1 %v4752_v14 }
  0xf8   : > { %v598_v44 = vadd.f32 %v4805_v28, %v597_v43  ;;  %3769 = vmatprep.mubr.msk.f32.mxu1 %vm462_vm0, %v658_v39 }
  0xf9   : > { %3770 = vmatmul.mubr.msk.f32.gmra.mrb[2].mxu1 %vm462_vm0, %v659_v41  ;;  %v661_v47 = vmax.f32 %v603_v42, 0.0 }
  0xfa   : > { %v660_v45 = vmax.f32 %v598_v44, 0.0  ;;  %v3745_v46 = vpop.f32.mrb[6].mxu0  ;;  %4181 = vmatpush3.bf16.msra.mxu1 %v4752_v14 }
  0xfb   : > { %v613_v48 = vadd.f32 %v3745_v46, %v4805_v28  ;;  %v607_v49 = vpop.f32.mrb[7].mxu0 }
  0xfc   : > { %v608_v50 = vadd.f32 %v4805_v28, %v607_v49  ;;  %3772 = vmatprep.mubr.msk.f32.mxu1 %vm462_vm0, %v660_v45 }
  0xfd   : > { %3773 = vmatmul.mubr.msk.f32.gmra.mrb[4].mxu1 %vm462_vm0, %v661_v47  ;;  %v663_v53 = vmax.f32 %v613_v48, 0.0 }
  0xfe   : > { %v662_v51 = vmax.f32 %v608_v50, 0.0  ;;  %v3748_v52 = vpop.f32.mrb[8].mxu0 }
  0xff   : > { %v623_v54 = vadd.f32 %v3748_v52, %v4805_v28  ;;  %v617_v55 = vpop.f32.mrb[9].mxu0 }
 0x100   : > { %v618_v56 = vadd.f32 %v4805_v28, %v617_v55  ;;  %3775 = vmatprep.mubr.msk.f32.mxu1 %vm462_vm0, %v662_v51 }
 0x101   : > { %3776 = vmatmul.mubr.msk.f32.gmra.mrb[6].mxu1 %vm462_vm0, %v663_v53  ;;  %v665_v59 = vmax.f32 %v623_v54, 0.0 }
 0x102   : > { %v664_v57 = vmax.f32 %v618_v56, 0.0  ;;  %v3751_v58 = vpop.f32.mrb[10].mxu0 }
 0x103   : > { %v633_v60 = vadd.f32 %v3751_v58, %v4805_v28  ;;  %v627_v61 = vpop.f32.mrb[11].mxu0 }
 0x104   : > { %v628_v62 = vadd.f32 %v4805_v28, %v627_v61  ;;  %3778 = vmatprep.mubr.msk.f32.mxu1 %vm462_vm0, %v664_v57 }
 0x105   : > { %3779 = vmatmul.mubr.msk.f32.gmra.mrb[8].mxu1 %vm462_vm0, %v665_v59  ;;  %v667_v1 = vmax.f32 %v633_v60, 0.0 }
 0x106   : > { %v666_v63 = vmax.f32 %v628_v62, 0.0  ;;  %v3754_v0 = vpop.f32.mrb[12].mxu0 }
 0x107   : > { %v643_v2 = vadd.f32 %v3754_v0, %v4805_v28  ;;  %v637_v3 = vpop.f32.mrb[13].mxu0 }
 0x108   : > { %v638_v4 = vadd.f32 %v4805_v28, %v637_v3  ;;  %3781 = vmatprep.mubr.msk.f32.mxu1 %vm462_vm0, %v666_v63  ;;  %v4887_v63 = vld [vmem:[%s4884_s28 + $0x40] sm:$0xff]  }
 0x109   : > { %3782 = vmatmul.mubr.msk.f32.gmra.mrb[10].mxu1 %vm462_vm0, %v667_v1  ;;  %v669_v7 = vmax.f32 %v643_v2, 0.0  ;;  %v3421_v0 = vunpack.c.l.bf16 %v4887_v63 }
 0x10a   : > { %v668_v5 = vmax.f32 %v638_v4, 0.0  ;;  %v3757_v6 = vpop.f32.mrb[14].mxu0 }
 0x10b   : > { %v653_v8 = vadd.f32 %v3757_v6, %v4805_v28  ;;  %v647_v9 = vpop.f32.mrb[15].mxu0  ;;  %3886 = vmatprep.mubr.f32.mxu0 %v3421_v0 }
 0x10c   : > { %v648_v10 = vadd.f32 %v4805_v28, %v647_v9  ;;  %3784 = vmatprep.mubr.msk.f32.mxu1 %vm462_vm0, %v668_v5  ;;  %v1620_v9 = vld [vmem:[%s5428_s4 + $0x8] sm:$0xff] }
 0x10d   : > { %3785 = vmatmul.mubr.msk.f32.gmra.mrb[12].mxu1 %vm462_vm0, %v669_v7  ;;  %v671_v14 = vmax.f32 %v653_v8, 0.0  ;;  %v1619_v8 = vld [vmem:[%s5428_s4] sm:$0xff] }
 0x10e   : > { %v670_v12 = vmax.f32 %v648_v10, 0.0  ;;  %v3800_v13 = vpop.f32.mrb[16].mxu0  ;;  %v1621_v10 = vld [vmem:[%s5428_s4 + $0x10] sm:$0xff] }
 0x10f   : > { %v998_v15 = vadd.f32 %v3800_v13, %v4842_v11  ;;  %v992_v16 = vpop.f32.mrb[17].mxu0 }
 0x110   : > { %v993_v17 = vadd.f32 %v4842_v11, %v992_v16  ;;  %3787 = vmatprep.mubr.msk.f32.mxu1 %vm462_vm0, %v670_v12 }
 0x111   : > { %3788 = vmatmul.mubr.msk.f32.gmra.mrb[14].mxu1 %vm462_vm0, %v671_v14  ;;  %v1072_v20 = vmax.f32 %v998_v15, 0.0  ;;  %v4246_v14 = vpack.c.bf16 %v1620_v9, %v1619_v8  ;;  %v1622_v15 = vld [vmem:[%s5428_s4 + $0x18] sm:$0xff] }
 0x112   : > { %v1071_v18 = vmax.f32 %v993_v17, 0.0  ;;  %v3803_v19 = vpop.f32.mrb[18].mxu0 }
 0x113   : > { %v1008_v21 = vadd.f32 %v3803_v19, %v4842_v11  ;;  %v1002_v22 = vpop.f32.mrb[19].mxu0  ;;  %4247 = vmatprep.subr.bf16.mxu1 %v4246_v14 }
 0x114   : > { %v1003_v23 = vadd.f32 %v4842_v11, %v1002_v22  ;;  %3830 = vmatprep.mubr.msk.f32.mxu1 %vm462_vm0, %v1071_v18  ;;  %v4250_v18 = vpack.c.bf16 %v1622_v15, %v1621_v10 }
 0x115   : > { %3831 = vmatmul.mubr.msk.f32.vlgmr.msra.gmra.mrb[16].mxu1 %vm462_vm0, %v1072_v20  ;;  %v1074_v26 = vmax.f32 %v1008_v21, 0.0 }
 0x116   : > { %v1073_v24 = vmax.f32 %v1003_v23, 0.0  ;;  %v3806_v25 = vpop.f32.mrb[20].mxu0  ;;  %4249 = vmatpush3.bf16.msra.mxu1 %v4246_v14 }
 0x117   : > { %v1018_v27 = vadd.f32 %v3806_v25, %v4842_v11  ;;  %v1012_v29 = vpop.f32.mrb[21].mxu0  ;;  %4251 = vmatprep.subr.bf16.mxu1 %v4250_v18 }
 0x118   : > { %v1013_v30 = vadd.f32 %v4842_v11, %v1012_v29  ;;  %3833 = vmatprep.mubr.msk.f32.mxu1 %vm462_vm0, %v1073_v24 }
 0x119   : > { %3834 = vmatmul.mubr.msk.f32.gmra.mrb[18].mxu1 %vm462_vm0, %v1074_v26  ;;  %v1076_v33 = vmax.f32 %v1018_v27, 0.0 }
 0x11a   : > { %v1075_v31 = vmax.f32 %v1013_v30, 0.0  ;;  %v3809_v32 = vpop.f32.mrb[22].mxu0  ;;  %4253 = vmatpush3.bf16.msra.mxu1 %v4250_v18 }
 0x11b   : > { %v1028_v34 = vadd.f32 %v3809_v32, %v4842_v11  ;;  %v1022_v35 = vpop.f32.mrb[23].mxu0 }
 0x11c   : > { %v1023_v36 = vadd.f32 %v4842_v11, %v1022_v35  ;;  %3836 = vmatprep.mubr.msk.f32.mxu1 %vm462_vm0, %v1075_v31 }
 0x11d   : > { %3837 = vmatmul.mubr.msk.f32.gmra.mrb[20].mxu1 %vm462_vm0, %v1076_v33  ;;  %v1078_v39 = vmax.f32 %v1028_v34, 0.0 }
 0x11e   : > { %v1077_v37 = vmax.f32 %v1023_v36, 0.0  ;;  %v3812_v38 = vpop.f32.mrb[24].mxu0 }
 0x11f   : > { %v1038_v40 = vadd.f32 %v3812_v38, %v4842_v11  ;;  %v1032_v41 = vpop.f32.mrb[25].mxu0 }
 0x120   : > { %v1033_v42 = vadd.f32 %v4842_v11, %v1032_v41  ;;  %3839 = vmatprep.mubr.msk.f32.mxu1 %vm462_vm0, %v1077_v37 }
 0x121   : > { %3840 = vmatmul.mubr.msk.f32.gmra.mrb[22].mxu1 %vm462_vm0, %v1078_v39  ;;  %v1080_v45 = vmax.f32 %v1038_v40, 0.0 }
 0x122   : > { %v1079_v43 = vmax.f32 %v1033_v42, 0.0  ;;  %v3815_v44 = vpop.f32.mrb[26].mxu0 }
 0x123   : > { %v1048_v46 = vadd.f32 %v3815_v44, %v4842_v11  ;;  %v1042_v47 = vpop.f32.mrb[27].mxu0 }
 0x124   : > { %v1043_v48 = vadd.f32 %v4842_v11, %v1042_v47  ;;  %3842 = vmatprep.mubr.msk.f32.mxu1 %vm462_vm0, %v1079_v43 }
 0x125   : > { %3843 = vmatmul.mubr.msk.f32.gmra.mrb[24].mxu1 %vm462_vm0, %v1080_v45  ;;  %v1082_v51 = vmax.f32 %v1048_v46, 0.0 }
 0x126   : > { %v1081_v49 = vmax.f32 %v1043_v48, 0.0  ;;  %v3818_v50 = vpop.f32.mrb[28].mxu0 }
 0x127   : > { %v1058_v52 = vadd.f32 %v3818_v50, %v4842_v11  ;;  %v1052_v53 = vpop.f32.mrb[29].mxu0 }
 0x128   : > { %v1053_v54 = vadd.f32 %v4842_v11, %v1052_v53  ;;  %3845 = vmatprep.mubr.msk.f32.mxu1 %vm462_vm0, %v1081_v49 }
 0x129   : > { %3846 = vmatmul.mubr.msk.f32.gmra.mrb[26].mxu1 %vm462_vm0, %v1082_v51  ;;  %v1084_v57 = vmax.f32 %v1058_v52, 0.0 }
 0x12a   : > { %v1083_v55 = vmax.f32 %v1053_v54, 0.0  ;;  %v3821_v56 = vpop.f32.mrb[30].mxu0 }
 0x12b   : > { %v1068_v58 = vadd.f32 %v3821_v56, %v4842_v11  ;;  %v1062_v59 = vpop.f32.mrb[31].mxu0 }
 0x12c   : > { %v1063_v60 = vadd.f32 %v4842_v11, %v1062_v59  ;;  %3848 = vmatprep.mubr.msk.f32.mxu1 %vm462_vm0, %v1083_v55 }
 0x12d   : > { %3849 = vmatmul.mubr.msk.f32.gmra.mrb[28].mxu1 %vm462_vm0, %v1084_v57  ;;  %v1086_v62 = vmax.f32 %v1068_v58, 0.0 }
 0x12e   : > { %v1085_v61 = vmax.f32 %v1063_v60, 0.0 }
 0x130   : > { %3851 = vmatprep.mubr.msk.f32.mxu1 %vm462_vm0, %v1085_v61 }
 0x131   : > { %3852 = vmatmul.mubr.msk.f32.gmra.mrb[30].mxu1 %vm462_vm0, %v1086_v62 }
 0x1c8   : > { %v3768_v1 = vpop.f32.mrb[0].mxu1 }
 0x1c9   : > { %v792_v2 = vadd.f32 %v3768_v1, %v4805_v28  ;;  %v786_v3 = vpop.f32.mrb[1].mxu1 }
 0x1ca   : > { %v787_v4 = vadd.f32 %v4805_v28, %v786_v3 }
 0x1cb   : > { %v866_v5 = vmax.f32 %v792_v2, 0.0 }
 0x1cc   : > { %v865_v6 = vmax.f32 %v787_v4, 0.0  ;;  %v3771_v7 = vpop.f32.mrb[2].mxu1 }
 0x1cd   : > { %v802_v12 = vadd.f32 %v3771_v7, %v4805_v28  ;;  %v796_v13 = vpop.f32.mrb[3].mxu1 }
 0x1ce   : > { %v4905_v16 = vpack.c.bf16 %v866_v5, %v865_v6  ;;  %v797_v17 = vadd.f32 %v4805_v28, %v796_v13 }
 0x1cf   : > { %v868_v19 = vmax.f32 %v802_v12, 0.0 }
 0x1d0   : > { %v867_v20 = vmax.f32 %v797_v17, 0.0  ;;  %v3774_v21 = vpop.f32.mrb[4].mxu1 }
 0x1d1   : > { %v812_v22 = vadd.f32 %v3774_v21, %v4805_v28  ;;  %v806_v23 = vpop.f32.mrb[5].mxu1 }
 0x1d2   : > { %v4909_v24 = vpack.c.bf16 %v868_v19, %v867_v20  ;;  %v807_v25 = vadd.f32 %v4805_v28, %v806_v23 }
 0x1d3   : > { %v870_v26 = vmax.f32 %v812_v22, 0.0 }
 0x1d4   : > { %v869_v27 = vmax.f32 %v807_v25, 0.0  ;;  %v3777_v29 = vpop.f32.mrb[6].mxu1 }
 0x1d5   : > { %v822_v30 = vadd.f32 %v3777_v29, %v4805_v28  ;;  %v816_v31 = vpop.f32.mrb[7].mxu1 }
 0x1d6   : > { %v4913_v32 = vpack.c.bf16 %v870_v26, %v869_v27  ;;  %v817_v33 = vadd.f32 %v4805_v28, %v816_v31 }
 0x1d7   : > { %v872_v34 = vmax.f32 %v822_v30, 0.0 }
 0x1d8   : > { %v871_v35 = vmax.f32 %v817_v33, 0.0  ;;  %v3780_v36 = vpop.f32.mrb[8].mxu1 }
 0x1d9   : > { %v832_v37 = vadd.f32 %v3780_v36, %v4805_v28  ;;  %v826_v38 = vpop.f32.mrb[9].mxu1 }
 0x1da   : > { %v4917_v39 = vpack.c.bf16 %v872_v34, %v871_v35  ;;  %v827_v40 = vadd.f32 %v4805_v28, %v826_v38 }
 0x1db   : > { %v874_v41 = vmax.f32 %v832_v37, 0.0 }
 0x1dc   : > { %v873_v42 = vmax.f32 %v827_v40, 0.0  ;;  %v3783_v43 = vpop.f32.mrb[10].mxu1 }
 0x1dd   : > { %v842_v44 = vadd.f32 %v3783_v43, %v4805_v28  ;;  %v836_v45 = vpop.f32.mrb[11].mxu1 }
 0x1de   : > { %v4921_v46 = vpack.c.bf16 %v874_v41, %v873_v42  ;;  %v837_v47 = vadd.f32 %v4805_v28, %v836_v45 }
 0x1df   : > { %v876_v48 = vmax.f32 %v842_v44, 0.0 }
 0x1e0   : > { %v875_v49 = vmax.f32 %v837_v47, 0.0  ;;  %v3786_v50 = vpop.f32.mrb[12].mxu1 }
 0x1e1   : > { %v852_v51 = vadd.f32 %v3786_v50, %v4805_v28  ;;  %v846_v52 = vpop.f32.mrb[13].mxu1 }
 0x1e2   : > { %v4925_v53 = vpack.c.bf16 %v876_v48, %v875_v49  ;;  %v847_v54 = vadd.f32 %v4805_v28, %v846_v52 }
 0x1e3   : > { %v878_v55 = vmax.f32 %v852_v51, 0.0 }
 0x1e4   : > { %v877_v56 = vmax.f32 %v847_v54, 0.0  ;;  %v3789_v57 = vpop.f32.mrb[14].mxu1 }
 0x1e5   : > { %v862_v58 = vadd.f32 %v3789_v57, %v4805_v28  ;;  %v856_v59 = vpop.f32.mrb[15].mxu1 }
 0x1e6   : > { %v4929_v60 = vpack.c.bf16 %v878_v55, %v877_v56  ;;  %v857_v61 = vadd.f32 %v4805_v28, %v856_v59 }
 0x1e7   : > { %v880_v62 = vmax.f32 %v862_v58, 0.0 }
 0x1e8   : > { %v879_v0 = vmax.f32 %v857_v61, 0.0  ;;  %v3832_v1 = vpop.f32.mrb[16].mxu1 }
 0x1e9   : > { %v1207_v2 = vadd.f32 %v3832_v1, %v4842_v11  ;;  %v1201_v3 = vpop.f32.mrb[17].mxu1 }
 0x1ea   : > { %v4933_v4 = vpack.c.bf16 %v880_v62, %v879_v0  ;;  %v1202_v5 = vadd.f32 %v4842_v11, %v1201_v3  ;;  %v3459_v3 = vld [vmem:[%s4884_s28 + $0x48] sm:$0xff]  }
 0x1eb   : > { %v1281_v6 = vmax.f32 %v1207_v2, 0.0 }
 0x1ec   : > { %v1280_v7 = vmax.f32 %v1202_v5, 0.0  ;;  %v3835_v8 = vpop.f32.mrb[18].mxu1  ;;  %v3422_v5 = vunpack.c.h.bf16 %v4887_v63 }
 0x1ed   : > { %v1217_v9 = vadd.f32 %v3835_v8, %v4842_v11  ;;  %v1211_v10 = vpop.f32.mrb[19].mxu1  ;;  %v3426_v8 = vunpack.c.h.bf16 %v3459_v3 }
 0x1ee   : > { %v4182_v12 = vpack.c.bf16 %v1281_v6, %v1280_v7  ;;  %v1212_v13 = vadd.f32 %v4842_v11, %v1211_v10  ;;  %v3425_v6 = vunpack.c.l.bf16 %v3459_v3  ;;  %v3460_v7 = vld [vmem:[%s4884_s28 + $0x50] sm:$0xff]  }
 0x1ef   : > { %v1283_v28 = vmax.f32 %v1217_v9, 0.0  ;;  %v3461_v9 = vld [vmem:[%s4884_s28 + $0x58] sm:$0xff]   ;;  %v3430_v10 = vunpack.c.h.bf16 %v3460_v7 }
 0x1f0   : > { %v1282_v14 = vmax.f32 %v1212_v13, 0.0  ;;  %v3838_v15 = vpop.f32.mrb[20].mxu1  ;;  %4183 = vmatprep.subr.bf16.mxu0 %v4182_v12  ;;  %v3433_v63 = vunpack.c.l.bf16 %v3461_v9  ;;  %v3434_v13 = vunpack.c.h.bf16 %v3461_v9 }
 0x1f1   : > { %v1227_v17 = vadd.f32 %v3838_v15, %v4842_v11  ;;  %v1221_v18 = vpop.f32.mrb[21].mxu1  ;;  %4185 = vmatpush3.bf16.msra.mxu0 %v4182_v12  ;;  %v3462_v12 = vld [vmem:[%s4884_s28 + $0x60] sm:$0xff]   ;;  %v3464_v15 = vld [vmem:[%s4884_s28 + $0x70] sm:$0xff]  }
 0x1f2   : > { %v4186_v19 = vpack.c.bf16 %v1283_v28, %v1282_v14  ;;  %v1222_v20 = vadd.f32 %v4842_v11, %v1221_v18  ;;  %v3463_v28 = vld [vmem:[%s4884_s28 + $0x68] sm:$0xff]   ;;  %v3438_v14 = vunpack.c.h.bf16 %v3462_v12  ;;  %v3465_v18 = vld [vmem:[%s4884_s28 + $0x78] sm:$0xff]  }
 0x1f3   : > { %v1285_v21 = vmax.f32 %v1227_v17, 0.0  ;;  %v3442_v17 = vunpack.c.h.bf16 %v3463_v28 }
 0x1f4   : > { %v1284_v22 = vmax.f32 %v1222_v20, 0.0  ;;  %v3841_v23 = vpop.f32.mrb[22].mxu1  ;;  %4187 = vmatprep.subr.bf16.mxu0 %v4186_v19  ;;  %v3388_v20 = vld [vmem:[%s4884_s28] sm:$0xff]  }
 0x1f5   : > { %v1237_v25 = vadd.f32 %v3841_v23, %v4842_v11  ;;  %v1231_v26 = vpop.f32.mrb[23].mxu1  ;;  %4189 = vmatpush3.bf16.msra.mxu0 %v4186_v19  ;;  %v3446_v19 = vunpack.c.h.bf16 %v3464_v15  ;;  %v3451_v23 = vld [vmem:[%s4884_s28 + $0x8] sm:$0xff]  }
 0x1f6   : > { %v4190_v27 = vpack.c.bf16 %v1285_v21, %v1284_v22  ;;  %v1232_v29 = vadd.f32 %v4842_v11, %v1231_v26  ;;  %v3291_v21 = vld [vmem:[%s5428_s4 + $0x40] sm:$0xff]  ;;  %v3450_v22 = vunpack.c.h.bf16 %v3465_v18  ;;  %v3293_v26 = vld [vmem:[%s5428_s4 + $0x50] sm:$0xff] }
 0x1f7   : > { %v1287_v30 = vmax.f32 %v1237_v25, 0.0 }
 0x1f8   : > { %v1286_v31 = vmax.f32 %v1232_v29, 0.0  ;;  %v3844_v33 = vpop.f32.mrb[24].mxu1  ;;  %4191 = vmatprep.subr.bf16.mxu0 %v4190_v27  ;;  %v3390_v29 = vunpack.c.h.bf16 %v3388_v20 }
 0x1f9   : > { %v1247_v34 = vadd.f32 %v3844_v33, %v4842_v11  ;;  %v1241_v35 = vpop.f32.mrb[25].mxu1  ;;  %4193 = vmatpush3.bf16.msra.mxu0 %v4190_v27  ;;  %v3294_v27 = vld [vmem:[%s5428_s4 + $0x58] sm:$0xff]  ;;  %v3394_v33 = vunpack.c.h.bf16 %v3451_v23 }
 0x1fa   : > { %v4194_v36 = vpack.c.bf16 %v1287_v30, %v1286_v31  ;;  %v1242_v37 = vadd.f32 %v4842_v11, %v1241_v35  ;;  %v3452_v30 = vld [vmem:[%s4884_s28 + $0x10] sm:$0xff]   ;;  %v4266_v31 = vpack.c.bf16 %v3294_v27, %v3293_v26  ;;  %v3453_v35 = vld [vmem:[%s4884_s28 + $0x18] sm:$0xff]  }
 0x1fb   : > { %v1289_v38 = vmax.f32 %v1247_v34, 0.0  ;;  %v3397_v34 = vunpack.c.l.bf16 %v3452_v30 }
 0x1fc   : > { %v1288_v40 = vmax.f32 %v1242_v37, 0.0  ;;  %v3847_v41 = vpop.f32.mrb[26].mxu1  ;;  %4195 = vmatprep.subr.bf16.mxu0 %v4194_v36  ;;  %v3401_v37 = vunpack.c.l.bf16 %v3453_v35 }
 0x1fd   : > { %v1257_v42 = vadd.f32 %v3847_v41, %v4842_v11  ;;  %v1251_v43 = vpop.f32.mrb[27].mxu1  ;;  %4197 = vmatpush3.bf16.msra.mxu0 %v4194_v36  ;;  %v3398_v36 = vunpack.c.h.bf16 %v3452_v30  ;;  %v3455_v41 = vld [vmem:[%s4884_s28 + $0x28] sm:$0xff]  }
 0x1fe   : > { %v4198_v44 = vpack.c.bf16 %v1289_v38, %v1288_v40  ;;  %v1252_v45 = vadd.f32 %v4842_v11, %v1251_v43  ;;  %v3402_v38 = vunpack.c.h.bf16 %v3453_v35  ;;  %v3409_v43 = vunpack.c.l.bf16 %v3455_v41 }
 0x1ff   : > { %v1291_v47 = vmax.f32 %v1257_v42, 0.0 }
 0x200   : > { %v1290_v48 = vmax.f32 %v1252_v45, 0.0  ;;  %v3850_v49 = vpop.f32.mrb[28].mxu1  ;;  %4199 = vmatprep.subr.bf16.mxu0 %v4198_v44  ;;  %v3410_v45 = vunpack.c.h.bf16 %v3455_v41 }
 0x201   : > { %v1267_v50 = vadd.f32 %v3850_v49, %v4842_v11  ;;  %v1261_v51 = vpop.f32.mrb[29].mxu1  ;;  %4201 = vmatpush3.bf16.msra.mxu0 %v4198_v44  ;;  %v3456_v44 = vld [vmem:[%s4884_s28 + $0x30] sm:$0xff]  }
 0x202   : > { %v4202_v52 = vpack.c.bf16 %v1291_v47, %v1290_v48  ;;  %v1262_v54 = vadd.f32 %v4842_v11, %v1261_v51  ;;  %v3413_v47 = vunpack.c.l.bf16 %v3456_v44  ;;  %v3457_v48 = vld [vmem:[%s4884_s28 + $0x38] sm:$0xff]   ;;  %v3414_v49 = vunpack.c.h.bf16 %v3456_v44 }
 0x203   : > { %v1293_v55 = vmax.f32 %v1267_v50, 0.0  ;;  %v3417_v50 = vunpack.c.l.bf16 %v3457_v48  ;;  %v3418_v51 = vunpack.c.h.bf16 %v3457_v48 }
 0x204   : > { %v1292_v56 = vmax.f32 %v1262_v54, 0.0  ;;  %v3853_v57 = vpop.f32.mrb[30].mxu1  ;;  %4203 = vmatprep.subr.bf16.mxu0 %v4202_v52  ;;  %v3270_v54 = vld [vmem:[%s5428_s4 + $0x28] sm:$0xff] }
 0x205   : > { %v1277_v58 = vadd.f32 %v3853_v57, %v4842_v11  ;;  %v1271_v59 = vpop.f32.mrb[31].mxu1  ;;  %4205 = vmatpush3.bf16.msra.mxu0 %v4202_v52  ;;  %v3269_v52 = vld [vmem:[%s5428_s4 + $0x20] sm:$0xff]  ;;  %v3272_v57 = vld [vmem:[%s5428_s4 + $0x38] sm:$0xff] }
 0x206   : > { %v4206_v61 = vpack.c.bf16 %v1293_v55, %v1292_v56  ;;  %v1272_v62 = vadd.f32 %v4842_v11, %v1271_v59  ;;  %v3429_v11 = vunpack.c.l.bf16 %v3460_v7  ;;  %v4254_v55 = vpack.c.bf16 %v3270_v54, %v3269_v52  ;;  %v3271_v56 = vld [vmem:[%s5428_s4 + $0x30] sm:$0xff] }
 0x207   : > { %v1295_v0 = vmax.f32 %v1277_v58, 0.0 }
 0x208   : > { %v1294_v1 = vmax.f32 %v1272_v62, 0.0  ;;  %4207 = vmatprep.subr.bf16.mxu0 %v4206_v61  ;;  %4255 = vmatprep.subr.bf16.mxu1 %v4254_v55 }
 0x209   : > { %4209 = vmatpush3.bf16.msra.mxu0 %v4206_v61  ;;  %v4258_v61 = vpack.c.bf16 %v3272_v57, %v3271_v56 }
 0x20a   : > { %v4210_v2 = vpack.c.bf16 %v1295_v0, %v1294_v1 }
 0x20c   : > { %4211 = vmatprep.subr.bf16.mxu0 %v4210_v2 }
 0x20d   : > { %4213 = vmatpush3.bf16.msra.mxu0 %v4210_v2 }
 0x20e   : > { %4215 = vmatprep.subr.bf16.mxu0 %v4905_v16 }
 0x210   : > { %3887 = vmatmul.mubr.f32.vlgmr.msra.gmra.mrb[32].mxu0 %v3422_v5 }
 0x211   : > { %4217 = vmatpush3.bf16.msra.mxu0 %v4905_v16  ;;  %3889 = vmatprep.mubr.f32.mxu0 %v3425_v6  ;;  %v3437_v16 = vunpack.c.l.bf16 %v3462_v12 }
 0x212   : > { %4219 = vmatprep.subr.bf16.mxu0 %v4909_v24 }
 0x214   : > { %3890 = vmatmul.mubr.f32.gmra.mrb[34].mxu0 %v3426_v8 }
 0x215   : > { %4221 = vmatpush3.bf16.msra.mxu0 %v4909_v24  ;;  %3892 = vmatprep.mubr.f32.mxu0 %v3429_v11  ;;  %v3441_v24 = vunpack.c.l.bf16 %v3463_v28 }
 0x216   : > { %4223 = vmatprep.subr.bf16.mxu0 %v4913_v32 }
 0x218   : > { %3893 = vmatmul.mubr.f32.gmra.mrb[36].mxu0 %v3430_v10 }
 0x219   : > { %4225 = vmatpush3.bf16.msra.mxu0 %v4913_v32  ;;  %3895 = vmatprep.mubr.f32.mxu0 %v3433_v63  ;;  %v3445_v32 = vunpack.c.l.bf16 %v3464_v15 }
 0x21a   : > { %4227 = vmatprep.subr.bf16.mxu0 %v4917_v39 }
 0x21c   : > { %3896 = vmatmul.mubr.f32.gmra.mrb[38].mxu0 %v3434_v13  ;;  %v2395_v13 = vld [vmem:[%s5430_s6] sm:$0xff] }
 0x21d   : > { %4229 = vmatpush3.bf16.msra.mxu0 %v4917_v39  ;;  %3898 = vmatprep.mubr.f32.mxu0 %v3437_v16  ;;  %v3449_v39 = vunpack.c.l.bf16 %v3465_v18  ;;  %v2396_v16 = vld [vmem:[%s5430_s6 + $0x8] sm:$0xff]  ;;  %v2615_v18 = vld [vmem:[%s5432_s8] sm:$0xff] }
 0x21e   : > { %4231 = vmatprep.subr.bf16.mxu0 %v4921_v46  ;;  %v4270_v28 = vpack.c.bf16 %v2396_v16, %v2395_v13 }
 0x220   : > { %3899 = vmatmul.mubr.f32.gmra.mrb[40].mxu0 %v3438_v14  ;;  %v2397_v14 = vld [vmem:[%s5430_s6 + $0x10] sm:$0xff] }
 0x221   : > { %4233 = vmatpush3.bf16.msra.mxu0 %v4921_v46  ;;  %3901 = vmatprep.mubr.f32.mxu0 %v3441_v24  ;;  %v3292_v46 = vld [vmem:[%s5428_s4 + $0x48] sm:$0xff]  ;;  %v2398_v24 = vld [vmem:[%s5430_s6 + $0x18] sm:$0xff] }
 0x222   : > { %4235 = vmatprep.subr.bf16.mxu0 %v4925_v53  ;;  %v4262_v25 = vpack.c.bf16 %v3292_v46, %v3291_v21  ;;  %v4274_v15 = vpack.c.bf16 %v2398_v24, %v2397_v14 }
 0x224   : > { %3902 = vmatmul.mubr.f32.gmra.mrb[42].mxu0 %v3442_v17  ;;  %v5069_v17 = vld [vmem:[%s5429_s5] ss:$0 sm:$0xff] }
 0x225   : > { %4237 = vmatpush3.bf16.msra.mxu0 %v4925_v53  ;;  %3904 = vmatprep.mubr.f32.mxu0 %v3445_v32  ;;  %v3389_v53 = vunpack.c.l.bf16 %v3388_v20  ;;  %v5074_v32 = vld [vmem:[%s5429_s5 + $0x2] ss:$0 sm:$0xff] }
 0x226   : > { %4239 = vmatprep.subr.bf16.mxu0 %v4929_v60 }
 0x228   : > { %3905 = vmatmul.mubr.f32.gmra.mrb[44].mxu0 %v3446_v19  ;;  %v2616_v19 = vld [vmem:[%s5432_s8 + $0x8] sm:$0xff] }
 0x229   : > { %4241 = vmatpush3.bf16.msra.mxu0 %v4929_v60  ;;  %3907 = vmatprep.mubr.f32.mxu0 %v3449_v39  ;;  %v3393_v60 = vunpack.c.l.bf16 %v3451_v23  ;;  %v4278_v39 = vpack.c.bf16 %v2616_v19, %v2615_v18 }
 0x22a   : > { %4243 = vmatprep.subr.bf16.mxu0 %v4933_v4 }
 0x22c   : > { %3908 = vmatmul.mubr.f32.gmra.mrb[46].mxu0 %v3450_v22 }
 0x22d   : > { %4245 = vmatpush3.bf16.msra.mxu0 %v4933_v4  ;;  %3942 = vmatprep.mubr.f32.mxu0 %v3389_v53  ;;  %v3454_v4 = vld [vmem:[%s4884_s28 + $0x20] sm:$0xff]   ;;  %s5354_s28 = scalar_lea.vmem [#allocation2], %s3144_s30  ;;  %s4599_s30 = smov [#allocation2]  }
 0x22e   : > { %4263 = vmatprep.subr.bf16.mxu0 %v4262_v25  ;;  %v3405_v40 = vunpack.c.l.bf16 %v3454_v4  ;;  %v3406_v42 = vunpack.c.h.bf16 %v3454_v4  ;;  %s3066_s29 = sshll.u32 %s5354_s28, 4  ;;  %s4539_s20 = sshll.u32 %s4599_s30, 4  ;;  %s5377_s29 = int_to_ptr.vmem [resolvable:$true] %s3066_s29  ;;  %s4540_s20 = int_to_ptr.vmem [resolvable:$false] %s4539_s20 }
 0x22f   : > { %s4535_s18 = scalar_lea.vmem %s5377_s29, 2048  ;;  %s4541_s23 = scalar_lea.vmem %s4540_s20, 4096 }
 0x230   : > { %3943 = vmatmul.mubr.f32.vlgmr.msra.gmra.mrb[32].mxu0 %v3390_v29  ;;  %p4536_p12 = scmp.ne.s32.totalorder %s5377_s29, %s4535_s18  ;;  %p4542_p1 = scmp.lt.s32.totalorder %s5377_s29, %s4540_s20 }
 0x231   : > { %3945 = vmatprep.mubr.f32.mxu0 %v3393_v60  ;;  %4265 = vmatpush3.bf16.msra.mxu0 %v4262_v25  ;;  %p4543_p2 = scmp.lt.s32.totalorder %s4541_s23, %s4535_s18 }
 0x232   : > { %4267 = vmatprep.subr.bf16.mxu0 %v4266_v31  ;;  %p4537_p13 = pnand %p4536_p12, %p4705_p5 }
 0x233   : > { %p4544_p3 = por %p4543_p2, %p4542_p1 }
 0x234   : > { %3946 = vmatmul.mubr.f32.gmra.mrb[34].mxu0 %v3394_v33  ;;  %p4538_p0 = pneg %p4537_p13 }
 0x235   : > { %3948 = vmatprep.mubr.f32.mxu0 %v3397_v34  ;;  %4269 = vmatpush3.bf16.msra.mxu0 %v4266_v31 }
 0x236   : > { %4279 = vmatprep.subr.bf16.mxu0 %v4278_v39  ;;  %p4545_p4 = pnand %p4544_p3, %p4538_p0 }
 0x238   : > { %3949 = vmatmul.mubr.f32.gmra.mrb[36].mxu0 %v3398_v36 }
 0x239   : > { %3951 = vmatprep.mubr.f32.mxu0 %v3401_v37 }
 0x23c   : > { %3952 = vmatmul.mubr.f32.gmra.mrb[38].mxu0 %v3402_v38 }
 0x23d   : > { %3954 = vmatprep.mubr.f32.mxu0 %v3405_v40 }
 0x240   : > { %3955 = vmatmul.mubr.f32.gmra.mrb[40].mxu0 %v3406_v42 }
 0x241   : > { %3957 = vmatprep.mubr.f32.mxu0 %v3409_v43 }
 0x244   : > { %3958 = vmatmul.mubr.f32.gmra.mrb[42].mxu0 %v3410_v45 }
 0x245   : > { %3960 = vmatprep.mubr.f32.mxu0 %v3413_v47 }
 0x248   : > { %3961 = vmatmul.mubr.f32.gmra.mrb[44].mxu0 %v3414_v49 }
 0x249   : > { %3963 = vmatprep.mubr.f32.mxu0 %v3417_v50 }
 0x24c   : > { %3964 = vmatmul.mubr.f32.gmra.mrb[46].mxu0 %v3418_v51 }
 0x303   : > { %v3944_v58 = vpop.f32.mrb[32].mxu0 }
 0x304   : > { %v1540_v59 = vpop.f32.mrb[33].mxu0 }
 0x305   : > { %3974 = vmatprep.mubr.msk.f32.mxu1 %vm462_vm0, %v1540_v59  ;;  %4038 = vmatprep.mubr.msk.f32.mxu0 %vm462_vm0, %v1540_v59 }
 0x306   : > { %3975 = vmatmul.mubr.msk.f32.vlgmr.msra.gmra.mrb[32].mxu1 %vm462_vm0, %v3944_v58  ;;  %4039 = vmatmul.mubr.msk.f32.vlgmr.msra.gmra.mrb[48].mxu0 %vm462_vm0, %v3944_v58 }
 0x307   : > { %v3947_v62 = vpop.f32.mrb[34].mxu0  ;;  %4257 = vmatpush3.bf16.msra.mxu1 %v4254_v55  ;;  %4281 = vmatpush3.bf16.msra.mxu0 %v4278_v39 }
 0x308   : > { %v1550_v0 = vpop.f32.mrb[35].mxu0  ;;  %4259 = vmatprep.subr.bf16.mxu1 %v4258_v61 }
 0x309   : > { %3977 = vmatprep.mubr.msk.f32.mxu1 %vm462_vm0, %v1550_v0  ;;  %4041 = vmatprep.mubr.msk.f32.mxu0 %vm462_vm0, %v1550_v0 }
 0x30a   : > { %3978 = vmatmul.mubr.msk.f32.gmra.mrb[34].mxu1 %vm462_vm0, %v3947_v62  ;;  %4042 = vmatmul.mubr.msk.f32.gmra.mrb[50].mxu0 %vm462_vm0, %v3947_v62 }
 0x30b   : > { %v3950_v1 = vpop.f32.mrb[36].mxu0  ;;  %4261 = vmatpush3.bf16.msra.mxu1 %v4258_v61 }
 0x30c   : > { %v1560_v2 = vpop.f32.mrb[37].mxu0  ;;  %4271 = vmatprep.subr.bf16.mxu1 %v4270_v28 }
 0x30d   : > { %3980 = vmatprep.mubr.msk.f32.mxu1 %vm462_vm0, %v1560_v2  ;;  %4044 = vmatprep.mubr.msk.f32.mxu0 %vm462_vm0, %v1560_v2 }
 0x30e   : > { %3981 = vmatmul.mubr.msk.f32.gmra.mrb[36].mxu1 %vm462_vm0, %v3950_v1  ;;  %4045 = vmatmul.mubr.msk.f32.gmra.mrb[52].mxu0 %vm462_vm0, %v3950_v1 }
 0x30f   : > { %v3953_v3 = vpop.f32.mrb[38].mxu0 }
 0x310   : > { %v1570_v5 = vpop.f32.mrb[39].mxu0 }
 0x311   : > { %3983 = vmatprep.mubr.msk.f32.mxu1 %vm462_vm0, %v1570_v5  ;;  %4047 = vmatprep.mubr.msk.f32.mxu0 %vm462_vm0, %v1570_v5 }
 0x312   : > { %3984 = vmatmul.mubr.msk.f32.gmra.mrb[38].mxu1 %vm462_vm0, %v3953_v3  ;;  %4048 = vmatmul.mubr.msk.f32.gmra.mrb[54].mxu0 %vm462_vm0, %v3953_v3 }
 0x313   : > { %v3956_v6 = vpop.f32.mrb[40].mxu0 }
 0x314   : > { %v1580_v7 = vpop.f32.mrb[41].mxu0 }
 0x315   : > { %3986 = vmatprep.mubr.msk.f32.mxu1 %vm462_vm0, %v1580_v7  ;;  %4050 = vmatprep.mubr.msk.f32.mxu0 %vm462_vm0, %v1580_v7 }
 0x316   : > { %3987 = vmatmul.mubr.msk.f32.gmra.mrb[40].mxu1 %vm462_vm0, %v3956_v6  ;;  %4051 = vmatmul.mubr.msk.f32.gmra.mrb[56].mxu0 %vm462_vm0, %v3956_v6 }
 0x317   : > { %v3959_v8 = vpop.f32.mrb[42].mxu0 }
 0x318   : > { %v1590_v11 = vpop.f32.mrb[43].mxu0 }
 0x319   : > { %3989 = vmatprep.mubr.msk.f32.mxu1 %vm462_vm0, %v1590_v11  ;;  %4053 = vmatprep.mubr.msk.f32.mxu0 %vm462_vm0, %v1590_v11 }
 0x31a   : > { %3990 = vmatmul.mubr.msk.f32.gmra.mrb[42].mxu1 %vm462_vm0, %v3959_v8  ;;  %4054 = vmatmul.mubr.msk.f32.gmra.mrb[58].mxu0 %vm462_vm0, %v3959_v8 }
 0x31b   : > { %v3962_v9 = vpop.f32.mrb[44].mxu0 }
 0x31c   : > { %v1600_v10 = vpop.f32.mrb[45].mxu0 }
 0x31d   : > { %3992 = vmatprep.mubr.msk.f32.mxu1 %vm462_vm0, %v1600_v10  ;;  %4056 = vmatprep.mubr.msk.f32.mxu0 %vm462_vm0, %v1600_v10 }
 0x31e   : > { %3993 = vmatmul.mubr.msk.f32.gmra.mrb[44].mxu1 %vm462_vm0, %v3962_v9  ;;  %4057 = vmatmul.mubr.msk.f32.gmra.mrb[60].mxu0 %vm462_vm0, %v3962_v9 }
 0x31f   : > { %v3965_v63 = vpop.f32.mrb[46].mxu0 }
 0x320   : > { %v1610_v12 = vpop.f32.mrb[47].mxu0 }
 0x321   : > { %3995 = vmatprep.mubr.msk.f32.mxu1 %vm462_vm0, %v1610_v12  ;;  %4059 = vmatprep.mubr.msk.f32.mxu0 %vm462_vm0, %v1610_v12 }
 0x322   : > { %3996 = vmatmul.mubr.msk.f32.gmra.mrb[46].mxu1 %vm462_vm0, %v3965_v63  ;;  %4060 = vmatmul.mubr.msk.f32.gmra.mrb[62].mxu0 %vm462_vm0, %v3965_v63 }
 0x323   : > { %4006 = vmatprep.mubr.msk.f32.mxu1 %vm462_vm0, %v1540_v59 }
 0x326   : > { %4007 = vmatmul.mubr.msk.f32.vlgmr.msra.gmra.mrb[48].mxu1 %vm462_vm0, %v3944_v58 }
 0x327   : > { %4009 = vmatprep.mubr.msk.f32.mxu1 %vm462_vm0, %v1550_v0  ;;  %4273 = vmatpush3.bf16.msra.mxu1 %v4270_v28 }
 0x328   : > { %4275 = vmatprep.subr.bf16.mxu1 %v4274_v15 }
 0x32a   : > { %4010 = vmatmul.mubr.msk.f32.gmra.mrb[50].mxu1 %vm462_vm0, %v3947_v62 }
 0x32b   : > { %4012 = vmatprep.mubr.msk.f32.mxu1 %vm462_vm0, %v1560_v2  ;;  %4277 = vmatpush3.bf16.msra.mxu1 %v4274_v15 }
 0x32e   : > { %4013 = vmatmul.mubr.msk.f32.gmra.mrb[52].mxu1 %vm462_vm0, %v3950_v1 }
 0x32f   : > { %4015 = vmatprep.mubr.msk.f32.mxu1 %vm462_vm0, %v1570_v5 }
 0x332   : > { %4016 = vmatmul.mubr.msk.f32.gmra.mrb[54].mxu1 %vm462_vm0, %v3953_v3 }
 0x333   : > { %4018 = vmatprep.mubr.msk.f32.mxu1 %vm462_vm0, %v1580_v7 }
 0x336   : > { %4019 = vmatmul.mubr.msk.f32.gmra.mrb[56].mxu1 %vm462_vm0, %v3956_v6 }
 0x337   : > { %4021 = vmatprep.mubr.msk.f32.mxu1 %vm462_vm0, %v1590_v11 }
 0x33a   : > { %4022 = vmatmul.mubr.msk.f32.gmra.mrb[58].mxu1 %vm462_vm0, %v3959_v8 }
 0x33b   : > { %4024 = vmatprep.mubr.msk.f32.mxu1 %vm462_vm0, %v1600_v10 }
 0x33e   : > { %4025 = vmatmul.mubr.msk.f32.gmra.mrb[60].mxu1 %vm462_vm0, %v3962_v9 }
 0x33f   : > { %4027 = vmatprep.mubr.msk.f32.mxu1 %vm462_vm0, %v1610_v12 }
 0x342   : > { %4028 = vmatmul.mubr.msk.f32.gmra.mrb[62].mxu1 %vm462_vm0, %v3965_v63 }
 0x3d9   : > { %v3976_v20 = vpop.f32.mrb[32].mxu1  ;;  %v4040_v21 = vpop.f32.mrb[48].mxu0 }
 0x3da   : > { %v1750_v46 = vadd.f32 %v3976_v20, %v5069_v17  ;;  %v2178_v22 = vadd.f32 %v4040_v21, %v5074_v32  ;;  %v1744_v53 = vpop.f32.mrb[33].mxu1  ;;  %v2172_v23 = vpop.f32.mrb[49].mxu0 }
 0x3db   : > { %v1745_v25 = vadd.f32 %v5069_v17, %v1744_v53  ;;  %v2173_v26 = vadd.f32 %v5074_v32, %v2172_v23 }
 0x3dc   : > { %v3254_v27 = vmul.f32 -1.442695, %v1750_v46  ;;  %v3314_v29 = vmul.f32 -1.442695, %v2178_v22 }
 0x3dd   : > { %v3253_v60 = vmul.f32 -1.442695, %v1745_v25  ;;  %v3313_v30 = vmul.f32 -1.442695, %v2173_v26  ;;  %v3979_v31 = vpop.f32.mrb[34].mxu1  ;;  %v4043_v33 = vpop.f32.mrb[50].mxu0 }
 0x3de   : > { %4343 = vpow2.f32 %v3254_v27  ;;  %v1760_v34 = vadd.f32 %v3979_v31, %v5069_v17  ;;  %v2188_v35 = vadd.f32 %v4043_v33, %v5074_v32  ;;  %v1754_v36 = vpop.f32.mrb[35].mxu1  ;;  %v2182_v37 = vpop.f32.mrb[51].mxu0 }
 0x3df   : > { %4345 = vpow2.f32 %v3314_v29  ;;  %v1755_v4 = vadd.f32 %v5069_v17, %v1754_v36  ;;  %v2183_v38 = vadd.f32 %v5074_v32, %v2182_v37 }
 0x3e0   : > { %4347 = vpow2.f32 %v3253_v60  ;;  %v3256_v40 = vmul.f32 -1.442695, %v1760_v34  ;;  %v3316_v41 = vmul.f32 -1.442695, %v2188_v35 }
 0x3e1   : > { %4349 = vpow2.f32 %v3313_v30  ;;  %v3255_v42 = vmul.f32 -1.442695, %v1755_v4  ;;  %v3315_v43 = vmul.f32 -1.442695, %v2183_v38  ;;  %v3982_v44 = vpop.f32.mrb[36].mxu1  ;;  %v4046_v45 = vpop.f32.mrb[52].mxu0 }
 0x3e2   : > { %4351 = vpow2.f32 %v3256_v40  ;;  %v1770_v47 = vadd.f32 %v3982_v44, %v5069_v17  ;;  %v1764_v48 = vpop.f32.mrb[37].mxu1  ;;  %v2192_v49 = vpop.f32.mrb[53].mxu0  ;;  %v2198_v50 = vadd.f32 %v4046_v45, %v5074_v32 }
 0x3e3   : > { %4353 = vpow2.f32 %v3316_v41  ;;  %v1765_v52 = vadd.f32 %v5069_v17, %v1764_v48  ;;  %v2193_v54 = vadd.f32 %v5074_v32, %v2192_v49 }
 0x3e4   : > { %4355 = vpow2.f32 %v3255_v42  ;;  %v3258_v51 = vmul.f32 -1.442695, %v1770_v47  ;;  %v3318_v61 = vmul.f32 -1.442695, %v2198_v50 }
 0x3e5   : > { %4357 = vpow2.f32 %v3315_v43  ;;  %v3985_v55 = vpop.f32.mrb[38].mxu1  ;;  %v4049_v56 = vpop.f32.mrb[54].mxu0  ;;  %v3257_v0 = vmul.f32 -1.442695, %v1765_v52  ;;  %v3317_v2 = vmul.f32 -1.442695, %v2193_v54 }
 0x3e6   : > { %4359 = vpow2.f32 %v3258_v51  ;;  %v1780_v57 = vadd.f32 %v3985_v55, %v5069_v17  ;;  %v1774_v58 = vpop.f32.mrb[39].mxu1  ;;  %v2202_v59 = vpop.f32.mrb[55].mxu0  ;;  %v2208_v22 = vadd.f32 %v4049_v56, %v5074_v32 }
 0x3e7   : > { %4361 = vpow2.f32 %v3318_v61  ;;  %v1775_v23 = vadd.f32 %v5069_v17, %v1774_v58  ;;  %v2203_v27 = vadd.f32 %v5074_v32, %v2202_v59 }
 0x3e8   : > { %v4344_v62 = vpop.eup %4343  ;;  %v3260_v6 = vmul.f32 -1.442695, %v1780_v57  ;;  %4363 = vpow2.f32 %v3257_v0  ;;  %v3320_v34 = vmul.f32 -1.442695, %v2208_v22 }
 0x3e9   : > { %v4346_v1 = vpop.eup %4345  ;;  %v3988_v3 = vpop.f32.mrb[40].mxu1  ;;  %v1872_v9 = vadd.f32 1.0, %v4344_v62  ;;  %4365 = vpow2.f32 %v3317_v2  ;;  %v3259_v37 = vmul.f32 -1.442695, %v1775_v23  ;;  %v3319_v41 = vmul.f32 -1.442695, %v2203_v27 }
 0x3ea   : > { %v4348_v5 = vpop.eup %4347  ;;  %v4052_v7 = vpop.f32.mrb[56].mxu0  ;;  %v2300_v12 = vadd.f32 1.0, %v4346_v1  ;;  %4367 = vpow2.f32 %v3260_v6  ;;  %v1790_v31 = vadd.f32 %v3988_v3, %v5069_v17 }
 0x3eb   : > { %v1784_v8 = vpop.f32.mrb[41].mxu1  ;;  %v4350_v11 = vpop.eup %4349  ;;  %v1871_v16 = vadd.f32 1.0, %v4348_v5  ;;  %4369 = vrcp.f32 %v1872_v9  ;;  %v2218_v35 = vadd.f32 %v4052_v7, %v5074_v32 }
 0x3ec   : > { %v2212_v10 = vpop.f32.mrb[57].mxu0  ;;  %v4352_v63 = vpop.eup %4351  ;;  %v2299_v24 = vadd.f32 1.0, %v4350_v11  ;;  %4371 = vrcp.f32 %v2300_v12  ;;  %v1785_v4 = vadd.f32 %v5069_v17, %v1784_v8  ;;  %v3262_v47 = vmul.f32 -1.442695, %v1790_v31 }
 0x3ed   : > { %v4354_v13 = vpop.eup %4353  ;;  %v3991_v28 = vpop.f32.mrb[42].mxu1  ;;  %v1874_v39 = vadd.f32 1.0, %v4352_v63  ;;  %4373 = vrcp.f32 %v1871_v16  ;;  %v2213_v42 = vadd.f32 %v5074_v32, %v2212_v10  ;;  %v3322_v51 = vmul.f32 -1.442695, %v2218_v35 }
 0x3ee   : > { %v4356_v14 = vpop.eup %4355  ;;  %v4055_v15 = vpop.f32.mrb[58].mxu0  ;;  %v2302_v46 = vadd.f32 1.0, %v4354_v13  ;;  %4375 = vrcp.f32 %v2299_v24  ;;  %v1800_v48 = vadd.f32 %v3991_v28, %v5069_v17  ;;  %v3261_v55 = vmul.f32 -1.442695, %v1785_v4 }
 0x3ef   : > { %v1794_v18 = vpop.f32.mrb[43].mxu1  ;;  %v4358_v19 = vpop.eup %4357  ;;  %v1873_v53 = vadd.f32 1.0, %v4356_v14  ;;  %4377 = vrcp.f32 %v1874_v39  ;;  %v2228_v52 = vadd.f32 %v4055_v15, %v5074_v32  ;;  %v3321_v58 = vmul.f32 -1.442695, %v2213_v42 }
 0x3f0   : > { %v2222_v20 = vpop.f32.mrb[59].mxu0  ;;  %v4360_v21 = vpop.eup %4359  ;;  %v2301_v26 = vadd.f32 1.0, %v4358_v19  ;;  %4379 = vrcp.f32 %v2302_v46  ;;  %v1795_v59 = vadd.f32 %v5069_v17, %v1794_v18  ;;  %v3264_v0 = vmul.f32 -1.442695, %v1800_v48 }
 0x3f1   : > { %v3994_v25 = vpop.f32.mrb[44].mxu1  ;;  %v4058_v29 = vpop.f32.mrb[60].mxu0  ;;  %v1876_v30 = vadd.f32 1.0, %v4360_v21  ;;  %4381 = vrcp.f32 %v1873_v53  ;;  %v3324_v2 = vmul.f32 -1.442695, %v2228_v52  ;;  %v2223_v3 = vadd.f32 %v5074_v32, %v2222_v20 }
 0x3f2   : > { %v5098_v60 = vpop.f32.mrb[45].mxu1  ;;  %v5101_v33 = vpop.f32.mrb[61].mxu0  ;;  %4383 = vrcp.f32 %v2301_v26  ;;  %v3263_v11 = vmul.f32 -1.442695, %v1795_v59  ;;  %v1810_v9 = vadd.f32 %v3994_v25, %v5069_v17  ;;  %v2238_v28 = vadd.f32 %v4058_v29, %v5074_v32 }
 0x3f3   : > { %v4362_v36 = vpop.eup %4361  ;;  %4385 = vrcp.f32 %v1876_v30  ;;  %v3323_v16 = vmul.f32 -1.442695, %v2223_v3  ;;  %v1805_v42 = vadd.f32 %v5069_v17, %v5098_v60 }
 0x3f4   : > { %v4364_v40 = vpop.eup %4363  ;;  %4387 = vpow2.f32 %v3320_v34  ;;  %v2304_v6 = vadd.f32 1.0, %v4362_v36  ;;  %v3266_v19 = vmul.f32 -1.442695, %v1810_v9  ;;  %v3326_v22 = vmul.f32 -1.442695, %v2238_v28 }
 0x3f5   : > { %v5105_v38 = vpop.f32.mrb[46].mxu1  ;;  %v5108_v43 = vpop.f32.mrb[62].mxu0  ;;  %4389 = vpow2.f32 %v3259_v37  ;;  %v1875_v12 = vadd.f32 1.0, %v4364_v40  ;;  %v3265_v60 = vmul.f32 -1.442695, %v1805_v42 }
 0x3f6   : > { %v5110_v44 = vpop.f32.mrb[47].mxu1  ;;  %v4366_v45 = vpop.eup %4365  ;;  %4391 = vpow2.f32 %v3319_v41  ;;  %v1820_v52 = vadd.f32 %v5105_v38, %v5069_v17  ;;  %v5179_v28 = vld [vmem:[%s5429_s5 + $0x1] ss:$0 sm:$0xff] }
 0x3f7   : > { %v5113_v49 = vpop.f32.mrb[63].mxu0  ;;  %v4368_v50 = vpop.eup %4367  ;;  %4393 = vpow2.f32 %v3262_v47  ;;  %v2303_v24 = vadd.f32 1.0, %v4366_v45 }
 0x3f8   : > { %v5116_v54 = vpop.eup %4369  ;;  %4395 = vpow2.f32 %v3322_v51  ;;  %v1878_v21 = vadd.f32 1.0, %v4368_v50  ;;  %v3268_v38 = vmul.f32 -1.442695, %v1820_v52 }
 0x3f9   : > { %v5118_v56 = vpop.f32.mrb[48].mxu1  ;;  %v5120_v57 = vpop.eup %4371  ;;  %4397 = vpow2.f32 %v3261_v55 }
 0x3fa   : > { %v5123_v61 = vpop.f32.mrb[49].mxu1  ;;  %v5125_v62 = vpop.eup %4373  ;;  %4399 = vpow2.f32 %v3321_v58 }
 0x3fb   : > { %v5127_v1 = vpop.eup %4375  ;;  %4401 = vpow2.f32 %v3264_v0 }
 0x3fc   : > { %v5130_v5 = vpop.eup %4377  ;;  %4403 = vpow2.f32 %v3324_v2  ;;  %v1815_v2 = vadd.f32 %v5069_v17, %v5110_v44 }
 0x3fd   : > { %v5132_v7 = vpop.f32.mrb[50].mxu1  ;;  %v5134_v8 = vpop.eup %4379  ;;  %4405 = vrcp.f32 %v2304_v6 }
 0x3fe   : > { %v5137_v10 = vpop.f32.mrb[51].mxu1  ;;  %v5139_v63 = vpop.eup %4381  ;;  %4407 = vpow2.f32 %v3263_v11  ;;  %v3267_v44 = vmul.f32 -1.442695, %v1815_v2 }
 0x3ff   : > { %v5141_v13 = vpop.eup %4383  ;;  %4409 = vrcp.f32 %v1875_v12 }
 0x400   : > { %v5144_v14 = vpop.eup %4385  ;;  %4411 = vpow2.f32 %v3323_v16 }
 0x401   : > { %v5146_v15 = vpop.f32.mrb[52].mxu1  ;;  %v4388_v18 = vpop.eup %4387  ;;  %4413 = vrcp.f32 %v2303_v24 }
 0x402   : > { %v5148_v39 = vpop.f32.mrb[53].mxu1  ;;  %v4390_v20 = vpop.eup %4389  ;;  %v2306_v23 = vadd.f32 1.0, %v4388_v18  ;;  %4415 = vpow2.f32 %v3266_v19 }
 0x403   : > { %v4392_v46 = vpop.eup %4391  ;;  %v1877_v27 = vadd.f32 1.0, %v4390_v20  ;;  %4417 = vrcp.f32 %v1878_v21 }
 0x404   : > { %v4394_v53 = vpop.eup %4393  ;;  %v2305_v31 = vadd.f32 1.0, %v4392_v46  ;;  %4419 = vpow2.f32 %v3326_v22  ;;  %v2004_v46 = vadd.f32 %v5118_v56, %v5179_v28  ;;  %v2233_v56 = vadd.f32 %v5074_v32, %v5101_v33 }
 0x405   : > { %v5150_v25 = vpop.f32.mrb[54].mxu1  ;;  %v4396_v26 = vpop.eup %4395  ;;  %v1880_v35 = vadd.f32 1.0, %v4394_v53  ;;  %4421 = vrcp.f32 %v2306_v23  ;;  %v1999_v53 = vadd.f32 %v5179_v28, %v5123_v61  ;;  %v2019_v33 = vadd.f32 %v5179_v28, %v5148_v39 }
 0x406   : > { %v5152_v29 = vpop.f32.mrb[55].mxu1  ;;  %v4398_v30 = vpop.eup %4397  ;;  %v2308_v37 = vadd.f32 1.0, %v4396_v26  ;;  %4423 = vrcp.f32 %v1877_v27  ;;  %v2014_v27 = vadd.f32 %v5132_v7, %v5179_v28  ;;  %v2024_v7 = vadd.f32 %v5146_v15, %v5179_v28 }
 0x407   : > { %v4400_v34 = vpop.eup %4399  ;;  %v1879_v41 = vadd.f32 1.0, %v4398_v30  ;;  %4425 = vrcp.f32 %v2305_v31 }
 0x408   : > { %v4402_v36 = vpop.eup %4401  ;;  %v2307_v48 = vadd.f32 1.0, %v4400_v34  ;;  %4427 = vrcp.f32 %v1880_v35  ;;  %v2009_v34 = vadd.f32 %v5179_v28, %v5137_v10  ;;  %v2248_v35 = vadd.f32 %v5108_v43, %v5074_v32 }
 0x409   : > { %v5154_v4 = vpop.f32.mrb[56].mxu1  ;;  %v4404_v40 = vpop.eup %4403  ;;  %v1882_v51 = vadd.f32 1.0, %v4402_v36  ;;  %4429 = vrcp.f32 %v2308_v37  ;;  %v2243_v37 = vadd.f32 %v5074_v32, %v5113_v49  ;;  %v2034_v10 = vadd.f32 %v5150_v25, %v5179_v28 }
 0x40a   : > { %v5158_v45 = vpop.f32.mrb[57].mxu1  ;;  %v5160_v47 = vpop.eup %4405  ;;  %v2310_v58 = vadd.f32 1.0, %v4404_v40  ;;  %4431 = vrcp.f32 %v1879_v41  ;;  %v3325_v41 = vmul.f32 -1.442695, %v2233_v56  ;;  %v3328_v42 = vmul.f32 -1.442695, %v2248_v35 }
 0x40b   : > { %v4408_v50 = vpop.eup %4407  ;;  %4433 = vrcp.f32 %v2307_v48  ;;  %v3327_v32 = vmul.f32 -1.442695, %v2243_v37  ;;  %v2029_v56 = vadd.f32 %v5179_v28, %v5152_v29 }
 0x40c   : > { %v5164_v55 = vpop.eup %4409  ;;  %v1881_v11 = vadd.f32 1.0, %v4408_v50  ;;  %4435 = vrcp.f32 %v1882_v51 }
 0x40d   : > { %v5166_v59 = vpop.f32.mrb[58].mxu1  ;;  %v4412_v0 = vpop.eup %4411  ;;  %4437 = vrcp.f32 %v2310_v58 }
 0x40e   : > { %v5170_v3 = vpop.f32.mrb[59].mxu1  ;;  %v5172_v6 = vpop.eup %4413  ;;  %v2309_v16 = vadd.f32 1.0, %v4412_v0  ;;  %4439 = vpow2.f32 %v3265_v60 }
 0x40f   : > { %v4416_v9 = vpop.eup %4415  ;;  %4441 = vrcp.f32 %v1881_v11  ;;  %v2049_v29 = vadd.f32 %v5179_v28, %v5170_v3 }
 0x410   : > { %v5174_v12 = vpop.eup %4417  ;;  %v1884_v20 = vadd.f32 1.0, %v4416_v9  ;;  %4443 = vpow2.f32 %v3268_v38 }
 0x411   : > { %v5181_v24 = vpop.f32.mrb[60].mxu1  ;;  %v5183_v17 = vpop.eup %4419  ;;  %4445 = vrcp.f32 %v2309_v16 }
 0x412   : > { %v5185_v18 = vpop.f32.mrb[61].mxu1  ;;  %v5187_v19 = vpop.eup %4421  ;;  %4447 = vpow2.f32 %v3267_v44 }
 0x413   : > { %v5189_v21 = vpop.eup %4423  ;;  %4449 = vrcp.f32 %v1884_v20 }
 0x414   : > { %v5193_v22 = vpop.eup %4425  ;;  %4451 = vtanh.f32 %v2004_v46 }
 0x415   : > { %v5197_v23 = vpop.f32.mrb[62].mxu1  ;;  %v5199_v26 = vpop.eup %4427  ;;  %4453 = vtanh.f32 %v1999_v53 }
 0x416   : > { %v5203_v30 = vpop.f32.mrb[63].mxu1  ;;  %v5205_v31 = vpop.eup %4429  ;;  %4455 = vtanh.f32 %v2014_v27 }
 0x417   : > { %v5211_v61 = vpop.eup %4431  ;;  %4457 = vtanh.f32 %v2009_v34  ;;  %v2069_v3 = vadd.f32 %v5179_v28, %v5203_v30 }
 0x418   : > { %v5217_v36 = vpop.eup %4433  ;;  %4459 = vtanh.f32 %v2024_v7 }
 0x419   : > { %v5223_v40 = vpop.eup %4435  ;;  %4461 = vtanh.f32 %v2019_v33 }
 0x41a   : > { %v5227_v43 = vpop.eup %4437  ;;  %4463 = vtanh.f32 %v2034_v10 }
 0x41b   : > { %v4440_v15 = vpop.eup %4439  ;;  %4465 = vpow2.f32 %v3325_v41 }
 0x41c   : > { %v5229_v48 = vpop.eup %4441  ;;  %v1883_v50 = vadd.f32 1.0, %v4440_v15  ;;  %4467 = vpow2.f32 %v3328_v42 }
 0x41d   : > { %v4444_v49 = vpop.eup %4443  ;;  %4469 = vpow2.f32 %v3327_v32 }
 0x41e   : > { %v5231_v39 = vpop.eup %4445  ;;  %v1886_v51 = vadd.f32 1.0, %v4444_v49  ;;  %4471 = vrcp.f32 %v1883_v50 }
 0x41f   : > { %v4448_v52 = vpop.eup %4447 }
 0x420   : > { %v5233_v25 = vpop.eup %4449  ;;  %v1885_v58 = vadd.f32 1.0, %v4448_v52  ;;  %4473 = vrcp.f32 %v1886_v51 }
 0x421   : > { %v4452_v0 = vpop.eup %4451 }
 0x422   : > { %v4454_v60 = vpop.eup %4453  ;;  %v2348_v2 = vmul.f32 %v4452_v0, %v5116_v54  ;;  %4475 = vrcp.f32 %v1885_v58 }
 0x423   : > { %v4456_v11 = vpop.eup %4455  ;;  %v2347_v9 = vmul.f32 %v4454_v60, %v5125_v62 }
 0x424   : > { %v4458_v38 = vpop.eup %4457  ;;  %4477 = vtanh.f32 %v2348_v2  ;;  %v2350_v16 = vmul.f32 %v4456_v11, %v5130_v5  ;;  %v2044_v5 = vadd.f32 %v5154_v4, %v5179_v28  ;;  %v2064_v4 = vadd.f32 %v5181_v24, %v5179_v28 }
 0x425   : > { %v4460_v44 = vpop.eup %4459  ;;  %4479 = vtanh.f32 %v2347_v9  ;;  %v2349_v20 = vmul.f32 %v4458_v38, %v5139_v63  ;;  %v2039_v63 = vadd.f32 %v5179_v28, %v5158_v45  ;;  %v2059_v45 = vadd.f32 %v5179_v28, %v5185_v18 }
 0x426   : > { %v4462_v46 = vpop.eup %4461  ;;  %4481 = vtanh.f32 %v2350_v16  ;;  %v2352_v53 = vmul.f32 %v4460_v44, %v5144_v14  ;;  %v2312_v24 = vadd.f32 1.0, %v5183_v17 }
 0x427   : > { %v4464_v27 = vpop.eup %4463  ;;  %4483 = vtanh.f32 %v2349_v20  ;;  %v2351_v54 = vmul.f32 %v4462_v46, %v5164_v55  ;;  %v2054_v55 = vadd.f32 %v5166_v59, %v5179_v28  ;;  %v2074_v59 = vadd.f32 %v5197_v23, %v5179_v28 }
 0x428   : > { %v4466_v62 = vpop.eup %4465  ;;  %4485 = vtanh.f32 %v2352_v53  ;;  %v2354_v34 = vmul.f32 %v4464_v27, %v5174_v12 }
 0x429   : > { %v4468_v35 = vpop.eup %4467  ;;  %4487 = vtanh.f32 %v2351_v54  ;;  %v2311_v18 = vadd.f32 1.0, %v4466_v62 }
 0x42a   : > { %v4470_v14 = vpop.eup %4469  ;;  %4489 = vtanh.f32 %v2354_v34  ;;  %v2314_v23 = vadd.f32 1.0, %v4468_v35 }
 0x42b   : > { %v5250_v7 = vpop.eup %4471  ;;  %4491 = vtanh.f32 %v2029_v56 }
 0x42c   : > { %v5254_v12 = vpop.eup %4473  ;;  %4493 = vtanh.f32 %v2044_v5 }
 0x42d   : > { %v5258_v37 = vpop.eup %4475  ;;  %4495 = vtanh.f32 %v2039_v63 }
 0x42e   : > { %v4478_v33 = vpop.eup %4477  ;;  %4497 = vtanh.f32 %v2054_v55 }
 0x42f   : > { %v4480_v10 = vpop.eup %4479  ;;  %4499 = vtanh.f32 %v2049_v29  ;;  %v2380_v41 = vmul.f32 %v4478_v33, %v5120_v57  ;;  %v2313_v57 = vadd.f32 1.0, %v4470_v14 }
 0x430   : > { %v4482_v15 = vpop.eup %4481  ;;  %4501 = vtanh.f32 %v2064_v4  ;;  %v2379_v42 = vmul.f32 %v4480_v10, %v5127_v1 }
 0x431   : > { %v4484_v32 = vpop.eup %4483  ;;  %4503 = vtanh.f32 %v2059_v45  ;;  %v2382_v49 = vmul.f32 %v4482_v15, %v5134_v8  ;;  %v3329_v45 = vld [vmem:[%s5431_s7] ss:$0 sm:$0xff] }
 0x432   : > { %v4486_v50 = vpop.eup %4485  ;;  %4505 = vtanh.f32 %v2074_v59  ;;  %4070 = vmatprep.mubr.msk.f32.mxu1 %vm462_vm0, %v2379_v42  ;;  %v2381_v28 = vmul.f32 %v4484_v32, %v5141_v13 }
 0x433   : > { %v4488_v30 = vpop.eup %4487  ;;  %4507 = vtanh.f32 %v2069_v3  ;;  %4071 = vmatmul.mubr.msk.f32.vlgmr.msra.gmra.mrb[64].mxu1 %vm462_vm0, %v2380_v41  ;;  %v2384_v17 = vmul.f32 %v4486_v50, %v5160_v47 }
 0x434   : > { %v4490_v1 = vpop.eup %4489  ;;  %4509 = vrcp.f32 %v2312_v24  ;;  %4073 = vmatprep.mubr.msk.f32.mxu1 %vm462_vm0, %v2381_v28  ;;  %v2383_v8 = vmul.f32 %v4488_v30, %v5172_v6 }
 0x435   : > { %v4492_v51 = vpop.eup %4491  ;;  %4511 = vrcp.f32 %v2311_v18  ;;  %v2386_v52 = vmul.f32 %v4490_v1, %v5187_v19 }
 0x436   : > { %v4494_v58 = vpop.eup %4493  ;;  %4513 = vrcp.f32 %v2314_v23  ;;  %v2353_v13 = vmul.f32 %v4492_v51, %v5189_v21 }
 0x437   : > { %v4496_v0 = vpop.eup %4495  ;;  %4515 = vrcp.f32 %v2313_v57  ;;  %v2356_v60 = vmul.f32 %v4494_v58, %v5199_v26  ;;  %4074 = vmatmul.mubr.msk.f32.gmra.mrb[66].mxu1 %vm462_vm0, %v2382_v49 }
 0x438   : > { %v4498_v47 = vpop.eup %4497  ;;  %4517 = vtanh.f32 %v2353_v13  ;;  %v2355_v2 = vmul.f32 %v4496_v0, %v5211_v61  ;;  %4076 = vmatprep.mubr.msk.f32.mxu1 %vm462_vm0, %v2383_v8 }
 0x439   : > { %v4500_v6 = vpop.eup %4499  ;;  %4519 = vtanh.f32 %v2356_v60  ;;  %v2358_v19 = vmul.f32 %v4498_v47, %v5223_v40 }
 0x43a   : > { %v4502_v11 = vpop.eup %4501  ;;  %4521 = vtanh.f32 %v2355_v2  ;;  %v2357_v21 = vmul.f32 %v4500_v6, %v5229_v48 }
 0x43b   : > { %v4504_v9 = vpop.eup %4503  ;;  %4523 = vtanh.f32 %v2358_v19  ;;  %v2360_v26 = vmul.f32 %v4502_v11, %v5233_v25  ;;  %4077 = vmatmul.mubr.msk.f32.gmra.mrb[68].mxu1 %vm462_vm0, %v2384_v17 }
 0x43c   : > { %v4506_v38 = vpop.eup %4505  ;;  %4525 = vtanh.f32 %v2357_v21  ;;  %v2359_v61 = vmul.f32 %v4504_v9, %v5250_v7 }
 0x43d   : > { %v4508_v16 = vpop.eup %4507  ;;  %4527 = vtanh.f32 %v2360_v26  ;;  %v2362_v44 = vmul.f32 %v4506_v38, %v5254_v12 }
 0x43e   : > { %v4510_v20 = vpop.eup %4509  ;;  %4529 = vtanh.f32 %v2359_v61  ;;  %v2361_v40 = vmul.f32 %v4508_v16, %v5258_v37 }
 0x43f   : > { %v4512_v46 = vpop.eup %4511  ;;  %4531 = vtanh.f32 %v2362_v44 }
 0x440   : > { %v4514_v48 = vpop.eup %4513  ;;  %4533 = vtanh.f32 %v2361_v40 }
 0x441   : > { %v4516_v53 = vpop.eup %4515 }
 0x442   : > { %v4518_v25 = vpop.eup %4517 }
 0x443   : > { %v4520_v27 = vpop.eup %4519  ;;  %v2385_v54 = vmul.f32 %v4518_v25, %v5193_v22 }
 0x444   : > { %v4522_v56 = vpop.eup %4521  ;;  %v2388_v62 = vmul.f32 %v4520_v27, %v5205_v31 }
 0x445   : > { %v4524_v34 = vpop.eup %4523  ;;  %4079 = vmatprep.mubr.msk.f32.mxu1 %vm462_vm0, %v2385_v54  ;;  %v2387_v5 = vmul.f32 %v4522_v56, %v5217_v36 }
 0x446   : > { %v4526_v35 = vpop.eup %4525  ;;  %4080 = vmatmul.mubr.msk.f32.gmra.mrb[70].mxu1 %vm462_vm0, %v2386_v52  ;;  %v2390_v63 = vmul.f32 %v4524_v34, %v5227_v43  ;;  %v2834_v43 = vld [vmem:[%s5434_s10] sm:$0xff] }
 0x447   : > { %v4528_v14 = vpop.eup %4527  ;;  %4082 = vmatprep.mubr.msk.f32.mxu1 %vm462_vm0, %v2387_v5  ;;  %v2389_v55 = vmul.f32 %v4526_v35, %v5231_v39  ;;  %v2835_v39 = vld [vmem:[%s5434_s10 + $0x8] sm:$0xff]  ;;  %v3346_v5 = vld [vmem:[%s5433_s9] ss:$0 sm:$0xff] }
 0x448   : > { %v4530_v7 = vpop.eup %4529  ;;  %v2392_v22 = vmul.f32 %v4528_v14, %v4510_v20  ;;  %v4282_v37 = vpack.c.bf16 %v2835_v39, %v2834_v43 }
 0x449   : > { %v4532_v29 = vpop.eup %4531  ;;  %v2391_v12 = vmul.f32 %v4530_v7, %v4512_v46 }
 0x44a   : > { %v4534_v31 = vpop.eup %4533  ;;  %4083 = vmatmul.mubr.msk.f32.gmra.mrb[72].mxu1 %vm462_vm0, %v2388_v62  ;;  %v2394_v4 = vmul.f32 %v4532_v29, %v4514_v48  ;;  %4283 = vmatprep.subr.bf16.mxu1 %v4282_v37 }
 0x44b   : > { %4085 = vmatprep.mubr.msk.f32.mxu1 %vm462_vm0, %v2389_v55  ;;  %v2393_v36 = vmul.f32 %v4534_v31, %v4516_v53  ;;  %4285 = vmatpush3.bf16.msra.mxu1 %v4282_v37 }
 0x44e   : > { %4086 = vmatmul.mubr.msk.f32.gmra.mrb[74].mxu1 %vm462_vm0, %v2390_v63 }
 0x44f   : > { %4088 = vmatprep.mubr.msk.f32.mxu1 %vm462_vm0, %v2391_v12 }
 0x452   : > { %4089 = vmatmul.mubr.msk.f32.gmra.mrb[76].mxu1 %vm462_vm0, %v2392_v22 }
 0x453   : > { %4091 = vmatprep.mubr.msk.f32.mxu1 %vm462_vm0, %v2393_v36 }
 0x456   : > { %4092 = vmatmul.mubr.msk.f32.gmra.mrb[78].mxu1 %vm462_vm0, %v2394_v4 }
 0x506   : > { %v4072_v33 = vpop.f32.mrb[64].mxu1 }
 0x507   : > { %v2526_v59 = vadd.f32 %v4072_v33, %v3329_v45  ;;  %v2520_v10 = vpop.f32.mrb[65].mxu1 }
 0x508   : > { %v2521_v3 = vadd.f32 %v3329_v45, %v2520_v10 }
 0x509   : > { %v2600_v24 = vmax.f32 %v2526_v59, 0.0 }
 0x50a   : > { %v2599_v41 = vmax.f32 %v2521_v3, 0.0  ;;  %v4075_v15 = vpop.f32.mrb[66].mxu1 }
 0x50b   : > { %v2536_v42 = vadd.f32 %v4075_v15, %v3329_v45  ;;  %v2530_v32 = vpop.f32.mrb[67].mxu1 }
 0x50c   : > { %v2531_v18 = vadd.f32 %v3329_v45, %v2530_v32  ;;  %4098 = vmatprep.mubr.msk.f32.mxu0 %vm2624_vm1, %v2599_v41 }
 0x50d   : > { %4099 = vmatmul.mubr.msk.f32.vlgmr.msra.gmra.mrb[64].mxu0 %vm2624_vm1, %v2600_v24  ;;  %v2602_v23 = vmax.f32 %v2536_v42, 0.0 }
 0x50e   : > { %v2601_v49 = vmax.f32 %v2531_v18, 0.0  ;;  %v4078_v50 = vpop.f32.mrb[68].mxu1 }
 0x50f   : > { %v2546_v28 = vadd.f32 %v4078_v50, %v3329_v45  ;;  %v2540_v30 = vpop.f32.mrb[69].mxu1 }
 0x510   : > { %v2541_v57 = vadd.f32 %v3329_v45, %v2540_v30  ;;  %4101 = vmatprep.mubr.msk.f32.mxu0 %vm2624_vm1, %v2601_v49 }
 0x511   : > { %4102 = vmatmul.mubr.msk.f32.gmra.mrb[66].mxu0 %vm2624_vm1, %v2602_v23  ;;  %v2604_v1 = vmax.f32 %v2546_v28, 0.0 }
 0x512   : > { %v2603_v17 = vmax.f32 %v2541_v57, 0.0 }
 0x514   : > { %4104 = vmatprep.mubr.msk.f32.mxu0 %vm2624_vm1, %v2603_v17 }
 0x515   : > { %4105 = vmatmul.mubr.msk.f32.gmra.mrb[68].mxu0 %vm2624_vm1, %v2604_v1 }
 0x519   : > { %v4081_v8 = vpop.f32.mrb[70].mxu1 }
 0x51a   : > { %v2556_v51 = vadd.f32 %v4081_v8, %v3329_v45  ;;  %v2550_v52 = vpop.f32.mrb[71].mxu1 }
 0x51b   : > { %v2551_v58 = vadd.f32 %v3329_v45, %v2550_v52 }
 0x51c   : > { %v2606_v60 = vmax.f32 %v2556_v51, 0.0 }
 0x51d   : > { %v2605_v13 = vmax.f32 %v2551_v58, 0.0  ;;  %v4084_v0 = vpop.f32.mrb[72].mxu1 }
 0x51e   : > { %v2566_v47 = vadd.f32 %v4084_v0, %v3329_v45  ;;  %v2560_v2 = vpop.f32.mrb[73].mxu1 }
 0x51f   : > { %v2561_v6 = vadd.f32 %v3329_v45, %v2560_v2  ;;  %4107 = vmatprep.mubr.msk.f32.mxu0 %vm2624_vm1, %v2605_v13 }
 0x520   : > { %4108 = vmatmul.mubr.msk.f32.gmra.mrb[70].mxu0 %vm2624_vm1, %v2606_v60  ;;  %v2608_v21 = vmax.f32 %v2566_v47, 0.0 }
 0x521   : > { %v2607_v19 = vmax.f32 %v2561_v6, 0.0  ;;  %v4087_v11 = vpop.f32.mrb[74].mxu1 }
 0x522   : > { %v2576_v9 = vadd.f32 %v4087_v11, %v3329_v45  ;;  %v2570_v26 = vpop.f32.mrb[75].mxu1 }
 0x523   : > { %v2571_v38 = vadd.f32 %v3329_v45, %v2570_v26  ;;  %4110 = vmatprep.mubr.msk.f32.mxu0 %vm2624_vm1, %v2607_v19 }
 0x524   : > { %4111 = vmatmul.mubr.msk.f32.gmra.mrb[72].mxu0 %vm2624_vm1, %v2608_v21  ;;  %v2610_v44 = vmax.f32 %v2576_v9, 0.0 }
 0x525   : > { %v2609_v61 = vmax.f32 %v2571_v38, 0.0  ;;  %v4090_v16 = vpop.f32.mrb[76].mxu1  ;;  %v3363_v38 = vld [vmem:[%s5435_s11] ss:$0 sm:$0xff] }
 0x526   : > { %v2586_v20 = vadd.f32 %v4090_v16, %v3329_v45  ;;  %v2580_v40 = vpop.f32.mrb[77].mxu1 }
 0x527   : > { %v2581_v46 = vadd.f32 %v3329_v45, %v2580_v40  ;;  %4113 = vmatprep.mubr.msk.f32.mxu0 %vm2624_vm1, %v2609_v61 }
 0x528   : > { %4114 = vmatmul.mubr.msk.f32.gmra.mrb[74].mxu0 %vm2624_vm1, %v2610_v44  ;;  %v2612_v25 = vmax.f32 %v2586_v20, 0.0 }
 0x529   : > { %v2611_v48 = vmax.f32 %v2581_v46, 0.0  ;;  %v4093_v53 = vpop.f32.mrb[78].mxu1 }
 0x52a   : > { %v2596_v27 = vadd.f32 %v4093_v53, %v3329_v45  ;;  %v2590_v54 = vpop.f32.mrb[79].mxu1 }
 0x52b   : > { %v2591_v56 = vadd.f32 %v3329_v45, %v2590_v54  ;;  %4116 = vmatprep.mubr.msk.f32.mxu0 %vm2624_vm1, %v2611_v48 }
 0x52c   : > { %4117 = vmatmul.mubr.msk.f32.gmra.mrb[76].mxu0 %vm2624_vm1, %v2612_v25  ;;  %v2614_v34 = vmax.f32 %v2596_v27, 0.0 }
 0x52d   : > { %v2613_v62 = vmax.f32 %v2591_v56, 0.0 }
 0x52f   : > { %4119 = vmatprep.mubr.msk.f32.mxu0 %vm2624_vm1, %v2613_v62 }
 0x530   : > { %4120 = vmatmul.mubr.msk.f32.gmra.mrb[78].mxu0 %vm2624_vm1, %v2614_v34 }
 0x5e0   : > { %v4100_v35 = vpop.f32.mrb[64].mxu0 }
 0x5e1   : > { %v2745_v63 = vadd.f32 %v4100_v35, %v3346_v5  ;;  %v2739_v14 = vpop.f32.mrb[65].mxu0 }
 0x5e2   : > { %v2740_v55 = vadd.f32 %v3346_v5, %v2739_v14 }
 0x5e3   : > { %v2819_v29 = vmax.f32 %v2745_v63, 0.0 }
 0x5e4   : > { %v2818_v7 = vmax.f32 %v2740_v55, 0.0  ;;  %v4103_v22 = vpop.f32.mrb[66].mxu0 }
 0x5e5   : > { %v2755_v12 = vadd.f32 %v4103_v22, %v3346_v5  ;;  %v2749_v31 = vpop.f32.mrb[67].mxu0 }
 0x5e6   : > { %v2750_v4 = vadd.f32 %v3346_v5, %v2749_v31  ;;  %4126 = vmatprep.mubr.msk.f32.mxu1 %vm2624_vm1, %v2818_v7 }
 0x5e7   : > { %4127 = vmatmul.mubr.msk.f32.vlgmr.msra.gmra.mrb[80].mxu1 %vm2624_vm1, %v2819_v29  ;;  %v2821_v39 = vmax.f32 %v2755_v12, 0.0 }
 0x5e8   : > { %v2820_v36 = vmax.f32 %v2750_v4, 0.0  ;;  %v4106_v43 = vpop.f32.mrb[68].mxu0 }
 0x5e9   : > { %v2765_v37 = vadd.f32 %v4106_v43, %v3346_v5  ;;  %v2759_v45 = vpop.f32.mrb[69].mxu0 }
 0x5ea   : > { %v2760_v33 = vadd.f32 %v3346_v5, %v2759_v45  ;;  %4129 = vmatprep.mubr.msk.f32.mxu1 %vm2624_vm1, %v2820_v36 }
 0x5eb   : > { %4130 = vmatmul.mubr.msk.f32.gmra.mrb[82].mxu1 %vm2624_vm1, %v2821_v39  ;;  %v2823_v10 = vmax.f32 %v2765_v37, 0.0 }
 0x5ec   : > { %v2822_v59 = vmax.f32 %v2760_v33, 0.0 }
 0x5ee   : > { %4132 = vmatprep.mubr.msk.f32.mxu1 %vm2624_vm1, %v2822_v59 }
 0x5ef   : > { %4133 = vmatmul.mubr.msk.f32.gmra.mrb[84].mxu1 %vm2624_vm1, %v2823_v10 }
 0x5f3   : > { %v4109_v3 = vpop.f32.mrb[70].mxu0 }
 0x5f4   : > { %v2775_v41 = vadd.f32 %v4109_v3, %v3346_v5  ;;  %v2769_v15 = vpop.f32.mrb[71].mxu0 }
 0x5f5   : > { %v2770_v24 = vadd.f32 %v3346_v5, %v2769_v15 }
 0x5f6   : > { %v2825_v18 = vmax.f32 %v2775_v41, 0.0 }
 0x5f7   : > { %v2824_v42 = vmax.f32 %v2770_v24, 0.0  ;;  %v4112_v32 = vpop.f32.mrb[72].mxu0 }
 0x5f8   : > { %v2785_v49 = vadd.f32 %v4112_v32, %v3346_v5  ;;  %v2779_v50 = vpop.f32.mrb[73].mxu0 }
 0x5f9   : > { %v2780_v23 = vadd.f32 %v3346_v5, %v2779_v50  ;;  %4135 = vmatprep.mubr.msk.f32.mxu1 %vm2624_vm1, %v2824_v42 }
 0x5fa   : > { %4136 = vmatmul.mubr.msk.f32.gmra.mrb[86].mxu1 %vm2624_vm1, %v2825_v18  ;;  %v2827_v57 = vmax.f32 %v2785_v49, 0.0 }
 0x5fb   : > { %v2826_v28 = vmax.f32 %v2780_v23, 0.0  ;;  %v4115_v30 = vpop.f32.mrb[74].mxu0 }
 0x5fc   : > { %v2795_v17 = vadd.f32 %v4115_v30, %v3346_v5  ;;  %v2789_v1 = vpop.f32.mrb[75].mxu0 }
 0x5fd   : > { %v2790_v8 = vadd.f32 %v3346_v5, %v2789_v1  ;;  %4138 = vmatprep.mubr.msk.f32.mxu1 %vm2624_vm1, %v2826_v28 }
 0x5fe   : > { %4139 = vmatmul.mubr.msk.f32.gmra.mrb[88].mxu1 %vm2624_vm1, %v2827_v57  ;;  %v2829_v58 = vmax.f32 %v2795_v17, 0.0 }
 0x5ff   : > { %v2828_v51 = vmax.f32 %v2790_v8, 0.0  ;;  %v4118_v52 = vpop.f32.mrb[76].mxu0 }
 0x600   : > { %v2805_v13 = vadd.f32 %v4118_v52, %v3346_v5  ;;  %v2799_v0 = vpop.f32.mrb[77].mxu0 }
 0x601   : > { %v2800_v60 = vadd.f32 %v3346_v5, %v2799_v0  ;;  %4141 = vmatprep.mubr.msk.f32.mxu1 %vm2624_vm1, %v2828_v51 }
 0x602   : > { %4142 = vmatmul.mubr.msk.f32.gmra.mrb[90].mxu1 %vm2624_vm1, %v2829_v58  ;;  %v2831_v6 = vmax.f32 %v2805_v13, 0.0 }
 0x603   : > { %v2830_v47 = vmax.f32 %v2800_v60, 0.0  ;;  %v4121_v2 = vpop.f32.mrb[78].mxu0 }
 0x604   : > { %v2815_v19 = vadd.f32 %v4121_v2, %v3346_v5  ;;  %v2809_v11 = vpop.f32.mrb[79].mxu0 }
 0x605   : > { %v2810_v21 = vadd.f32 %v3346_v5, %v2809_v11  ;;  %4144 = vmatprep.mubr.msk.f32.mxu1 %vm2624_vm1, %v2830_v47 }
 0x606   : > { %4145 = vmatmul.mubr.msk.f32.gmra.mrb[92].mxu1 %vm2624_vm1, %v2831_v6  ;;  %v2833_v26 = vmax.f32 %v2815_v19, 0.0 }
 0x607   : > { %v2832_v9 = vmax.f32 %v2810_v21, 0.0 }
 0x609   : > { %4147 = vmatprep.mubr.msk.f32.mxu1 %vm2624_vm1, %v2832_v9 }
 0x60a   : > { %4148 = vmatmul.mubr.msk.f32.gmra.mrb[94].mxu1 %vm2624_vm1, %v2833_v26 }
 0x6ba   : > { %v4128_v61 = vpop.f32.mrb[80].mxu1 }
 0x6bb   : > { %v2963_v16 = vadd.f32 %v4128_v61, %v3363_v38  ;;  %v2957_v44 = vpop.f32.mrb[81].mxu1 }
 0x6bc   : > { %v2958_v20 = vadd.f32 %v3363_v38, %v2957_v44 }
 0x6bd   : > { %3037 = vst [vmem:[%s5354_s28 + $0x8] sm:$0xff] %v2963_v16 }
 0x6be   : > { %3036 = vst [vmem:[%s5354_s28] sm:$0xff] %v2958_v20  ;;  %v4131_v40 = vpop.f32.mrb[82].mxu1 }
 0x6bf   : > { %v2973_v46 = vadd.f32 %v4131_v40, %v3363_v38  ;;  %v2967_v48 = vpop.f32.mrb[83].mxu1 }
 0x6c0   : > { %v2968_v53 = vadd.f32 %v3363_v38, %v2967_v48 }
 0x6c1   : > { %3039 = vst [vmem:[%s5354_s28 + $0x18] sm:$0xff] %v2973_v46 }
 0x6c2   : > { %3038 = vst [vmem:[%s5354_s28 + $0x10] sm:$0xff] %v2968_v53  ;;  %v4134_v25 = vpop.f32.mrb[84].mxu1 }
 0x6c3   : > { %v2983_v27 = vadd.f32 %v4134_v25, %v3363_v38  ;;  %v2977_v54 = vpop.f32.mrb[85].mxu1 }
 0x6c4   : > { %v2978_v56 = vadd.f32 %v3363_v38, %v2977_v54 }
 0x6c5   : > { %3041 = vst [vmem:[%s5354_s28 + $0x28] sm:$0xff] %v2983_v27 }
 0x6c6   : > { %3040 = vst [vmem:[%s5354_s28 + $0x20] sm:$0xff] %v2978_v56 }
 0x6cd   : > { %v4137_v62 = vpop.f32.mrb[86].mxu1 }
 0x6ce   : > { %v2993_v34 = vadd.f32 %v4137_v62, %v3363_v38  ;;  %v2987_v5 = vpop.f32.mrb[87].mxu1 }
 0x6cf   : > { %v2988_v35 = vadd.f32 %v3363_v38, %v2987_v5 }
 0x6d0   : > { %3043 = vst [vmem:[%s5354_s28 + $0x38] sm:$0xff] %v2993_v34 }
 0x6d1   : > { %3042 = vst [vmem:[%s5354_s28 + $0x30] sm:$0xff] %v2988_v35  ;;  %v4140_v63 = vpop.f32.mrb[88].mxu1 }
 0x6d2   : > { %v3003_v14 = vadd.f32 %v4140_v63, %v3363_v38  ;;  %v2997_v55 = vpop.f32.mrb[89].mxu1 }
 0x6d3   : > { %v2998_v7 = vadd.f32 %v3363_v38, %v2997_v55 }
 0x6d4   : > { %3045 = vst [vmem:[%s5354_s28 + $0x48] sm:$0xff] %v3003_v14 }
 0x6d5   : > { %3044 = vst [vmem:[%s5354_s28 + $0x40] sm:$0xff] %v2998_v7  ;;  %v4143_v22 = vpop.f32.mrb[90].mxu1 }
 0x6d6   : > { %v3013_v29 = vadd.f32 %v4143_v22, %v3363_v38  ;;  %v3007_v12 = vpop.f32.mrb[91].mxu1 }
 0x6d7   : > { %v3008_v31 = vadd.f32 %v3363_v38, %v3007_v12 }
 0x6d8   : > { %3047 = vst [vmem:[%s5354_s28 + $0x58] sm:$0xff] %v3013_v29 }
 0x6d9   : > { %3046 = vst [vmem:[%s5354_s28 + $0x50] sm:$0xff] %v3008_v31  ;;  %v4146_v4 = vpop.f32.mrb[92].mxu1 }
 0x6da   : > { %v3023_v36 = vadd.f32 %v4146_v4, %v3363_v38  ;;  %v3017_v43 = vpop.f32.mrb[93].mxu1 }
 0x6db   : > { %v3018_v39 = vadd.f32 %v3363_v38, %v3017_v43 }
 0x6dc   : > { %3049 = vst [vmem:[%s5354_s28 + $0x68] sm:$0xff] %v3023_v36 }
 0x6dd   : > { %3048 = vst [vmem:[%s5354_s28 + $0x60] sm:$0xff] %v3018_v39  ;;  %v4149_v37 = vpop.f32.mrb[94].mxu1 }
 0x6de   : > { %v3033_v45 = vadd.f32 %v4149_v37, %v3363_v38  ;;  %v3027_v33 = vpop.f32.mrb[95].mxu1 }
 0x6df   : > { %v3028_v59 = vadd.f32 %v3363_v38, %v3027_v33 }
 0x6e0   : > { %3051 = vst [vmem:[%s5354_s28 + $0x78] sm:$0xff] %v3033_v45 }
 0x6e1   : > { %3050 = vst [vmem:[%s5354_s28 + $0x70] sm:$0xff] %v3028_v59 }
 0x6e2   : > { %4548 = shalt.err (!%p4545_p4)
}
 0x6e3   : > { %s4549_s19 = scalar_lea.hbm %s5375_s17, 2048  ;;  %s4553_s15 = scalar_lea.hbm %s5436_s12, 16384 }
 0x6e4   : > { %p4550_p7 = scmp.ne.s32.totalorder %s5375_s17, %s4549_s19  ;;  %p4554_p10 = scmp.lt.u32.totalorder %s5375_s17, %s5436_s12 }
 0x6e5   : > { %p4555_p11 = scmp.lt.u32.totalorder %s4553_s15, %s4549_s19  ;;  %p4557_p13 = scmp.lt.u32.totalorder %s4549_s19, %s5375_s17 }
 0x6e6   : > { %p4551_p8 = pnand %p4550_p7, %p4705_p5 }
 0x6e7   : > { %p4556_p12 = por %p4555_p11, %p4554_p10 }
 0x6e8   : > { %p4552_p9 = pneg %p4551_p8 }
 0x6e9   : > { %p4558_p0 = por %p4557_p13, %p4556_p12 }
 0x6eb   : > { %p4559_p1 = pnand %p4558_p0, %p4552_p9 }
 0x6ed   : > { %4562 = shalt.err (!%p4559_p1)
}
 0x6ee   : > { %s4600_s18 = smov 128   ;;  %s4601_s20 = smov 8  }
 0x6ef   : > { %4302 = dma.vmem_to_hbm [thread:$0]  (%p4705_p5), %s5377_s29, 2048, %s5375_s17, %s5383_s25, %s4600_s18, %s4600_s18, %s4601_s20  }
 0x6f0 PF: > { %p4308_p2 = scmp.ge.s32.totalorder %s4597_s24, 2  ;;  %s3081_s23 = sand.u32 1, %s4585_s21  }
 0x6f1   : > { %s3082_s19 = scalar_lea.sflag [#allocation3], %s3081_s23 }
 0x6f2   : > { %p4305_p3 = pnand %p4308_p2, %p4709_p6 }
 0x6f4   : > { %4580 = dma.done.wait (!%p4305_p3), %s3082_s19, 2048  }
 0x6f5   : > { %4582 = vsyncadd (!%p4305_p3), %s3082_s19, 4294965248  ;;  %s5442_s28 = sld [smem:[#allocation5_spill]]  ;;  %s5443_s23 = sld [smem:[#allocation6_spill]] }
 0x6f6   : > { %p22_p4 = scmp.ge.s32.totalorder %s4692_s27, 10   ;;  %s5444_s21 = smov %s4589_s22 }
 0x6f7   : > { %s5446_s24 = smov %s4692_s27 }
 0x6f8   :  { %24 = sbr.rel (!%p22_p4) target bundleno = 3 (0x3), region = 113 }
 0x6fb   : > { %s5445_s22 = smov %s5442_s28 }
 0x6ff   :  { %3087 = vsyncpa [#allocation3], 1 }
 0x700   :  { %3089 = vsyncpa [#allocation3 + $0x1], 1 }

</bundles_post_ra>
